<compile_context>
chip_gen: v6e
topology: v6e:2x2x1
jax: 0.10.0
libtpu: 0.0.40
codegen_flags: <defaults>
</compile_context>

<pallas_src>
import jax
import jax.numpy as jnp
from jax.experimental import pallas as pl
from jax.experimental.pallas import tpu as pltpu


# ---------------------------------------------------------------------------
# helpers
# ---------------------------------------------------------------------------
def _round_up(x, m):
    return ((x + m - 1) // m) * m


def _align_channels(c):
    """Lane-dense channel padding: 128 always; 256-granular for large channels
    (v6e/v7x MXU is 2x256x256) when the extra padded FLOPs are < ~10%."""
    if c >= 256 and _round_up(c, 256) <= int(c * 1.1):
        return _round_up(c, 256)
    return _round_up(c, 128)


def _pad_last(a, target):
    pad = target - a.shape[-1]
    return a if pad == 0 else jnp.pad(a, [(0, 0)] * (a.ndim - 1) + [(0, pad)])


def _pad_2d(w, rows, cols):
    return jnp.pad(w, ((0, rows - w.shape[0]), (0, cols - w.shape[1])))


def _fold_bn(layer, dom, eps=1e-5):
    """Fold eval-mode DSBN into per-SAMPLE scale/shift (gathered by domain)."""
    inv = jax.lax.rsqrt(layer["var"] + eps)        # (nd, C)
    scale = layer["gamma"] * inv
    shift = layer["beta"] - layer["mean"] * scale
    return scale[dom], shift[dom]                   # (N, C) each, f32


def _vmem_budget():
    """(physical VMEM bytes, vmem_limit to request) for this generation."""
    phys = 64 * 1024 * 1024                         # conservative (v7x) default
    try:
        info = pltpu.get_tpu_info()
        phys = int(getattr(info, "vmem_capacity_bytes", phys))
    except Exception:
        pass
    limit = min(int(phys * 0.75), 96 * 1024 * 1024)  # 96 MiB v5e/v6e, 48 MiB v7x
    return phys, limit


def _pick_hw_tile(hw, n, cp_in, cp_outs, weight_bytes, limit, phys):
    """Row tile: largest multiple-of-8 fitting the VMEM budget, capped per
    generation, then shrunk so the parallel grid has >= 4 steps."""
    cp_out = cp_outs[-1]
    # per-row VMEM: double-buffered bf16 in/out tiles + widest f32 intermediate
    per_row = 2 * cp_in * 2 + 2 * cp_out * 2 + 4 * max(cp_outs)
    budget = max(int(limit * 0.7) - weight_bytes, 8 * per_row)
    t_vmem = budget // per_row
    max_tile = 2048 if phys >= 100 * 1024 * 1024 else 512   # v5e/v6e vs v7x
    t = min(_round_up(hw, 8), max_tile, t_vmem)
    t = max(t - t % 8, 8)
    while t > 8 and n * pl.cdiv(hw, t) < 4:        # feed both v7x TCs
        t = max(t // 2 - (t // 2) % 8, 8)
    return t, pl.cdiv(hw, t)


def _plan_segments(cps, limit):
    """Greedily pack consecutive blocks into pallas_call segments so each
    segment's (single-buffered bf16) weights sit well inside the VMEM budget."""
    budget = max(int(limit * 0.5), 2 * 1024 * 1024)
    segs, start, wbytes = [], 0, 0
    for i in range(len(cps) - 1):
        b = cps[i] * cps[i + 1] * 2
        if i > start and wbytes + b > budget:
            segs.append((start, i))
            start, wbytes = i, 0
        wbytes += b
    segs.append((start, len(cps) - 1))
    return segs


# ---------------------------------------------------------------------------
# kernel
# ---------------------------------------------------------------------------
def _make_chain_kernel(n_blocks):
    """relu(relu(...relu(x@W1*s1+b1)...)@Wk*sk+bk): all intermediates stay in
    VMEM/vregs as bf16; MXU matmuls accumulate in f32; affine+ReLU in f32."""
    def kernel(*refs):
        x_ref = refs[0]
        o_ref = refs[-1]
        h = x_ref[0]                                        # (thw, Cp0) bf16
        for i in range(n_blocks):
            w_ref = refs[1 + 3 * i]                         # (Cpi, Cpo) bf16
            sc_ref = refs[2 + 3 * i]                        # (1, 1, Cpo) f32
            sh_ref = refs[3 + 3 * i]
            y = jnp.dot(h, w_ref[...], preferred_element_type=jnp.float32)
            y = jnp.maximum(y * sc_ref[0] + sh_ref[0], 0.0)
            h = y.astype(jnp.bfloat16)
        o_ref[0] = h
    return kernel


# ---------------------------------------------------------------------------
# pallas_call wrapper for one fused segment of the chain
# ---------------------------------------------------------------------------
def _fused_segment(x_pad, dom, layers, cps, phys, limit):
    """x_pad: (N, HW, cps[0]) bf16 channel-padded activation.
    Returns (N, HW, cps[-1]) bf16 channel-padded activation (no HBM round-trip
    between the blocks inside this segment)."""
    N, HW, _ = x_pad.shape
    nb = len(layers)

    ws, scs, shs = [], [], []
    for i, layer in enumerate(layers):
        ws.append(_pad_2d(layer["w"], cps[i], cps[i + 1]).astype(jnp.bfloat16))
        sc, sh = _fold_bn(layer, dom)
        # zero padding of scale/shift keeps padded lanes exactly zero (inert)
        scs.append(_pad_last(sc, cps[i + 1])[:, None, :])   # (N, 1, Cpo) f32
        shs.append(_pad_last(sh, cps[i + 1])[:, None, :])

    weight_bytes = sum(w.size * 2 for w in ws)
    thw, gh = _pick_hw_tile(HW, N, cps[0], cps[1:], weight_bytes, limit, phys)

    args = [x_pad]
    for i in range(nb):
        args += [ws[i], scs[i], shs[i]]

    flops = sum(2 * N * HW * cps[i] * cps[i + 1] + 4 * N * HW * cps[i + 1]
                for i in range(nb))
    bytes_accessed = (x_pad.size * 2 + weight_bytes
                      + sum(s.size * 4 for s in scs + shs)
                      + N * HW * cps[-1] * 2)

    def call(single_buffer_weights):
        if single_buffer_weights:
            # weights never change per grid step -> single-buffer to save VMEM
            def wspec(shape):
                return pl.BlockSpec(shape, lambda n, h: (0, 0),
                                    pipeline_mode=pl.Buffered(1))
        else:
            def wspec(shape):
                return pl.BlockSpec(shape, lambda n, h: (0, 0))

        in_specs = [pl.BlockSpec((1, thw, cps[0]), lambda n, h: (n, h, 0))]
        for i in range(nb):
            in_specs += [
                wspec((cps[i], cps[i + 1])),
                pl.BlockSpec((1, 1, cps[i + 1]), lambda n, h: (n, 0, 0)),
                pl.BlockSpec((1, 1, cps[i + 1]), lambda n, h: (n, 0, 0)),
            ]

        return pl.pallas_call(
            _make_chain_kernel(nb),
            grid=(N, gh),
            in_specs=in_specs,
            out_specs=pl.BlockSpec((1, thw, cps[-1]), lambda n, h: (n, h, 0)),
            out_shape=jax.ShapeDtypeStruct((N, HW, cps[-1]), jnp.bfloat16),
            compiler_params=pltpu.CompilerParams(
                dimension_semantics=("parallel", "parallel"),
                vmem_limit_bytes=limit),
            cost_estimate=pl.CostEstimate(flops=int(flops), transcendentals=0,
                                          bytes_accessed=int(bytes_accessed)),
        )(*args)

    try:
        return call(True)
    except Exception:
        # pipeline_mode / Buffered(1) unsupported on this jax build -> default
        # double-buffered weights (correctness identical).
        return call(False)


# ---------------------------------------------------------------------------
# TwoInputSequential.forward
# ---------------------------------------------------------------------------
def two_input_sequential_forward(params, x_nchw, dom):
    """Forward (input1, input2) through the chain; input2 (domain ids) is
    passed through unchanged, as in the PyTorch container."""
    if not params:
        return x_nchw, dom

    N, C, H, W = x_nchw.shape
    HW = H * W
    cps = [_align_channels(C)] + [_align_channels(p["w"].shape[1]) for p in params]
    phys, limit = _vmem_budget()

    # one fused XLA pass: NCHW -> (N, HW, Cp0), channel pad, bf16 cast
    x = jnp.transpose(x_nchw, (0, 2, 3, 1)).reshape(N, HW, C)
    x = _pad_last(x, cps[0]).astype(jnp.bfloat16)

    # bf16, channel-padded activations flow straight between segments.
    for (s, e) in _plan_segments(cps, limit):
        x = _fused_segment(x, dom, params[s:e], cps[s:e + 1], phys, limit)

    Cout = params[-1]["w"].shape[1]
    out = jnp.transpose(
        x[:, :, :Cout].astype(jnp.float32).reshape(N, H, W, Cout), (0, 3, 1, 2))
    return out, dom


# ---------------------------------------------------------------------------
# pure-JAX reference (bf16 matmul operands / activations, f32 accumulate --
# matches the kernel's numerics path)
# ---------------------------------------------------------------------------
def _ref_forward(params, x_nchw, dom):
    N, C, H, W = x_nchw.shape
    x = jnp.transpose(x_nchw, (0, 2, 3, 1)).reshape(N, H * W, C)
    x = x.astype(jnp.bfloat16)
    for layer in params:
        inv = jax.lax.rsqrt(layer["var"] + 1e-5)
        scale = (layer["gamma"] * inv)[dom]
        shift = (layer["beta"] - layer["mean"] * layer["gamma"] * inv)[dom]
        y = jnp.einsum("nsc,cd->nsd", x, layer["w"].astype(jnp.bfloat16),
                       preferred_element_type=jnp.float32)
        x = jnp.maximum(y * scale[:, None, :] + shift[:, None, :],
                        0.0).astype(jnp.bfloat16)
    Cout = x.shape[-1]
    out = jnp.transpose(x.astype(jnp.float32).reshape(N, H, W, Cout), (0, 3, 1, 2))
    return out, dom


def make_params(key, channels=(4, 8, 8), num_domains=2):
    """Deterministic synthetic parameters for the sequential's blocks."""
    params = []
    for i in range(len(channels) - 1):
        cin, cout = channels[i], channels[i + 1]
        key, kw, kg, kb, km, kv = jax.random.split(key, 6)
        params.append({
            "w": jax.random.normal(kw, (cin, cout), jnp.float32) * 0.2,
            "gamma": 1.0 + 0.1 * jax.random.normal(kg, (num_domains, cout), jnp.float32),
            "beta": 0.1 * jax.random.normal(kb, (num_domains, cout), jnp.float32),
            "mean": 0.1 * jax.random.normal(km, (num_domains, cout), jnp.float32),
            "var": jnp.abs(jax.random.normal(kv, (num_domains, cout), jnp.float32)) + 0.5,
        })
    return params


if __name__ == "__main__":
    key = jax.random.PRNGKey(0)
    kx, kp = jax.random.split(key)

    N, C, H, W = 2, 4, 16, 16
    x = jax.random.normal(kx, (N, C, H, W), jnp.float32)    # input1 (NCHW)
    dom = jnp.array([0, 1], dtype=jnp.int32)                # input2 (domain ids)

    # 2-block chain (fully fused in one pallas_call)
    params = make_params(kp, channels=(C, 8, 8), num_domains=2)
    out1, out2 = jax.block_until_ready(
        two_input_sequential_forward(params, x, dom))
    ref1, ref2 = _ref_forward(params, x, dom)
    assert out1.shape == (N, 8, H, W)
    assert out1.dtype == jnp.float32
    assert jnp.allclose(out1, ref1, atol=2e-3, rtol=2e-3)
    assert jnp.array_equal(out2, ref2)

    # 3-block chain (exercises a longer fused chain in the same kernel factory)
    params3 = make_params(kp, channels=(C, 8, 8, 8), num_domains=2)
    out3, _ = jax.block_until_ready(
        two_input_sequential_forward(params3, x, dom))
    ref3, _ = _ref_forward(params3, x, dom)
    assert jnp.allclose(out3, ref3, atol=2e-3, rtol=2e-3)

    print("KERNEL_OK")
</pallas_src>

<mosaic_0001>
module attributes {stable_mosaic.version = 11 : i64} {
  func.func @kernel(%arg0: i32, %arg1: i32, %arg2: memref<1x128x128xbf16, #tpu.memory_space<vmem>>, %arg3: memref<128x128xbf16, #tpu.memory_space<vmem>>, %arg4: memref<1x1x128xf32, #tpu.memory_space<vmem>>, %arg5: memref<1x1x128xf32, #tpu.memory_space<vmem>>, %arg6: memref<128x128xbf16, #tpu.memory_space<vmem>>, %arg7: memref<1x1x128xf32, #tpu.memory_space<vmem>>, %arg8: memref<1x1x128xf32, #tpu.memory_space<vmem>>, %arg9: memref<1x128x128xbf16, #tpu.memory_space<vmem>>) attributes {dimension_semantics = [#tpu.dimension_semantics<parallel>, #tpu.dimension_semantics<parallel>], iteration_bounds = array<i64: 2, 2>, scalar_prefetch = 0 : i64, scratch_operands = 0 : i64, tpu.core_type = #tpu.core_type<tc>, window_params = [{transform_indices = @transform_0, window_bounds = array<i64: 1, 128, 128>}, {pipeline_mode = #tpu.pipeline_mode<synchronous>, transform_indices = @transform_1, window_bounds = array<i64: 128, 128>}, {transform_indices = @transform_2, window_bounds = array<i64: 1, 1, 128>}, {transform_indices = @transform_3, window_bounds = array<i64: 1, 1, 128>}, {pipeline_mode = #tpu.pipeline_mode<synchronous>, transform_indices = @transform_4, window_bounds = array<i64: 128, 128>}, {transform_indices = @transform_5, window_bounds = array<i64: 1, 1, 128>}, {transform_indices = @transform_6, window_bounds = array<i64: 1, 1, 128>}, {transform_indices = @transform_7, window_bounds = array<i64: 1, 128, 128>}]} {
    %c0 = arith.constant 0 : index
    %c0_0 = arith.constant 0 : index
    %c0_1 = arith.constant 0 : index
    %0 = vector.load %arg2[%c0, %c0_0, %c0_1] : memref<1x128x128xbf16, #tpu.memory_space<vmem>>, vector<1x128x128xbf16>
    %1 = vector.shape_cast %0 : vector<1x128x128xbf16> to vector<128x128xbf16>
    %c0_2 = arith.constant 0 : index
    %c0_3 = arith.constant 0 : index
    %2 = vector.load %arg3[%c0_2, %c0_3] : memref<128x128xbf16, #tpu.memory_space<vmem>>, vector<128x128xbf16>
    %cst = arith.constant dense<0.000000e+00> : vector<128x128xf32>
    %3 = tpu.matmul %1, %2, %cst {dimension_numbers = #tpu.dot_dimension_numbers<[1], [0], [0], [1], [0, 0, 1, 1], [], []>} : vector<128x128xbf16>, vector<128x128xbf16>, vector<128x128xf32> -> vector<128x128xf32>
    %c0_4 = arith.constant 0 : index
    %c0_5 = arith.constant 0 : index
    %c0_6 = arith.constant 0 : index
    %4 = vector.load %arg4[%c0_4, %c0_5, %c0_6] : memref<1x1x128xf32, #tpu.memory_space<vmem>>, vector<1x1x128xf32>
    %5 = vector.shape_cast %4 : vector<1x1x128xf32> to vector<1x128xf32>
    %6 = vector.broadcast %5 : vector<1x128xf32> to vector<128x128xf32>
    %7 = arith.mulf %3, %6 : vector<128x128xf32>
    %c0_7 = arith.constant 0 : index
    %c0_8 = arith.constant 0 : index
    %c0_9 = arith.constant 0 : index
    %8 = vector.load %arg5[%c0_7, %c0_8, %c0_9] : memref<1x1x128xf32, #tpu.memory_space<vmem>>, vector<1x1x128xf32>
    %9 = vector.shape_cast %8 : vector<1x1x128xf32> to vector<1x128xf32>
    %10 = vector.broadcast %9 : vector<1x128xf32> to vector<128x128xf32>
    %11 = arith.addf %7, %10 : vector<128x128xf32>
    %cst_10 = arith.constant 0.000000e+00 : f32
    %12 = vector.broadcast %cst_10 : f32 to vector<128x128xf32>
    %13 = arith.maximumf %11, %12 : vector<128x128xf32>
    %14 = arith.truncf %13 : vector<128x128xf32> to vector<128x128xbf16>
    %c0_11 = arith.constant 0 : index
    %c0_12 = arith.constant 0 : index
    %15 = vector.load %arg6[%c0_11, %c0_12] : memref<128x128xbf16, #tpu.memory_space<vmem>>, vector<128x128xbf16>
    %cst_13 = arith.constant dense<0.000000e+00> : vector<128x128xf32>
    %16 = tpu.matmul %14, %15, %cst_13 {dimension_numbers = #tpu.dot_dimension_numbers<[1], [0], [0], [1], [0, 0, 1, 1], [], []>} : vector<128x128xbf16>, vector<128x128xbf16>, vector<128x128xf32> -> vector<128x128xf32>
    %c0_14 = arith.constant 0 : index
    %c0_15 = arith.constant 0 : index
    %c0_16 = arith.constant 0 : index
    %17 = vector.load %arg7[%c0_14, %c0_15, %c0_16] : memref<1x1x128xf32, #tpu.memory_space<vmem>>, vector<1x1x128xf32>
    %18 = vector.shape_cast %17 : vector<1x1x128xf32> to vector<1x128xf32>
    %19 = vector.broadcast %18 : vector<1x128xf32> to vector<128x128xf32>
    %20 = arith.mulf %16, %19 : vector<128x128xf32>
    %c0_17 = arith.constant 0 : index
    %c0_18 = arith.constant 0 : index
    %c0_19 = arith.constant 0 : index
    %21 = vector.load %arg8[%c0_17, %c0_18, %c0_19] : memref<1x1x128xf32, #tpu.memory_space<vmem>>, vector<1x1x128xf32>
    %22 = vector.shape_cast %21 : vector<1x1x128xf32> to vector<1x128xf32>
    %23 = vector.broadcast %22 : vector<1x128xf32> to vector<128x128xf32>
    %24 = arith.addf %20, %23 : vector<128x128xf32>
    %cst_20 = arith.constant 0.000000e+00 : f32
    %25 = vector.broadcast %cst_20 : f32 to vector<128x128xf32>
    %26 = arith.maximumf %24, %25 : vector<128x128xf32>
    %27 = arith.truncf %26 : vector<128x128xf32> to vector<128x128xbf16>
    %c0_21 = arith.constant 0 : index
    %c0_22 = arith.constant 0 : index
    %c0_23 = arith.constant 0 : index
    %28 = vector.load %arg9[%c0_21, %c0_22, %c0_23] : memref<1x128x128xbf16, #tpu.memory_space<vmem>>, vector<1x128x128xbf16>
    %29 = vector.shape_cast %28 : vector<1x128x128xbf16> to vector<128x128xbf16>
    %30 = vector.shape_cast %27 : vector<128x128xbf16> to vector<1x128x128xbf16>
    tpu.vector_store %arg9[%c0_21, %c0_22, %c0_23], %30 {strides = array<i32>} : memref<1x128x128xbf16, #tpu.memory_space<vmem>>, vector<1x128x128xbf16>,
    return
  }
  func.func @transform_0(%arg0: i32, %arg1: i32) -> (i32, i32, i32) {
    %c0_i32 = arith.constant 0 : i32
    %c0_i32_0 = arith.constant 0 : i32
    return %arg0, %arg1, %c0_i32 : i32, i32, i32
  }
  func.func @transform_1(%arg0: i32, %arg1: i32) -> (i32, i32) {
    %c0_i32 = arith.constant 0 : i32
    %c0_i32_0 = arith.constant 0 : i32
    %c0_i32_1 = arith.constant 0 : i32
    return %c0_i32, %c0_i32_0 : i32, i32
  }
  func.func @transform_2(%arg0: i32, %arg1: i32) -> (i32, i32, i32) {
    %c0_i32 = arith.constant 0 : i32
    %c0_i32_0 = arith.constant 0 : i32
    %c0_i32_1 = arith.constant 0 : i32
    return %arg0, %c0_i32, %c0_i32_0 : i32, i32, i32
  }
  func.func @transform_3(%arg0: i32, %arg1: i32) -> (i32, i32, i32) {
    %c0_i32 = arith.constant 0 : i32
    %c0_i32_0 = arith.constant 0 : i32
    %c0_i32_1 = arith.constant 0 : i32
    return %arg0, %c0_i32, %c0_i32_0 : i32, i32, i32
  }
  func.func @transform_4(%arg0: i32, %arg1: i32) -> (i32, i32) {
    %c0_i32 = arith.constant 0 : i32
    %c0_i32_0 = arith.constant 0 : i32
    %c0_i32_1 = arith.constant 0 : i32
    return %c0_i32, %c0_i32_0 : i32, i32
  }
  func.func @transform_5(%arg0: i32, %arg1: i32) -> (i32, i32, i32) {
    %c0_i32 = arith.constant 0 : i32
    %c0_i32_0 = arith.constant 0 : i32
    %c0_i32_1 = arith.constant 0 : i32
    return %arg0, %c0_i32, %c0_i32_0 : i32, i32, i32
  }
  func.func @transform_6(%arg0: i32, %arg1: i32) -> (i32, i32, i32) {
    %c0_i32 = arith.constant 0 : i32
    %c0_i32_0 = arith.constant 0 : i32
    %c0_i32_1 = arith.constant 0 : i32
    return %arg0, %c0_i32, %c0_i32_0 : i32, i32, i32
  }
  func.func @transform_7(%arg0: i32, %arg1: i32) -> (i32, i32, i32) {
    %c0_i32 = arith.constant 0 : i32
    %c0_i32_0 = arith.constant 0 : i32
    return %arg0, %arg1, %c0_i32 : i32, i32, i32
  }
}

module attributes {stable_mosaic.version = 11 : i64} {
  func.func @kernel(%arg0: i32, %arg1: i32, %arg2: memref<1x128x128xbf16, #tpu.memory_space<vmem>>, %arg3: memref<128x128xbf16, #tpu.memory_space<vmem>>, %arg4: memref<1x1x128xf32, #tpu.memory_space<vmem>>, %arg5: memref<1x1x128xf32, #tpu.memory_space<vmem>>, %arg6: memref<128x128xbf16, #tpu.memory_space<vmem>>, %arg7: memref<1x1x128xf32, #tpu.memory_space<vmem>>, %arg8: memref<1x1x128xf32, #tpu.memory_space<vmem>>, %arg9: memref<1x128x128xbf16, #tpu.memory_space<vmem>>) attributes {dimension_semantics = [#tpu.dimension_semantics<parallel>, #tpu.dimension_semantics<parallel>], iteration_bounds = array<i64: 2, 2>, scalar_prefetch = 0 : i64, scratch_operands = 0 : i64, tpu.core_type = #tpu.core_type<tc>, window_params = [{transform_indices = @transform_0, window_bounds = array<i64: 1, 128, 128>}, {pipeline_mode = #tpu.pipeline_mode<synchronous>, transform_indices = @transform_1, window_bounds = array<i64: 128, 128>}, {transform_indices = @transform_2, window_bounds = array<i64: 1, 1, 128>}, {transform_indices = @transform_3, window_bounds = array<i64: 1, 1, 128>}, {pipeline_mode = #tpu.pipeline_mode<synchronous>, transform_indices = @transform_4, window_bounds = array<i64: 128, 128>}, {transform_indices = @transform_5, window_bounds = array<i64: 1, 1, 128>}, {transform_indices = @transform_6, window_bounds = array<i64: 1, 1, 128>}, {transform_indices = @transform_7, window_bounds = array<i64: 1, 128, 128>}]} {
    %c0 = arith.constant 0 : index
    %c0_0 = arith.constant 0 : index
    %c0_1 = arith.constant 0 : index
    %0 = vector.load %arg2[%c0, %c0_0, %c0_1] : memref<1x128x128xbf16, #tpu.memory_space<vmem>>, vector<1x128x128xbf16>
    %1 = vector.shape_cast %0 : vector<1x128x128xbf16> to vector<128x128xbf16>
    %c0_2 = arith.constant 0 : index
    %c0_3 = arith.constant 0 : index
    %2 = vector.load %arg3[%c0_2, %c0_3] : memref<128x128xbf16, #tpu.memory_space<vmem>>, vector<128x128xbf16>
    %cst = arith.constant dense<0.000000e+00> : vector<128x128xf32>
    %3 = tpu.matmul %1, %2, %cst {dimension_numbers = #tpu.dot_dimension_numbers<[1], [0], [0], [1], [0, 0, 1, 1], [], []>} : vector<128x128xbf16>, vector<128x128xbf16>, vector<128x128xf32> -> vector<128x128xf32>
    %c0_4 = arith.constant 0 : index
    %c0_5 = arith.constant 0 : index
    %c0_6 = arith.constant 0 : index
    %4 = vector.load %arg4[%c0_4, %c0_5, %c0_6] : memref<1x1x128xf32, #tpu.memory_space<vmem>>, vector<1x1x128xf32>
    %5 = vector.shape_cast %4 : vector<1x1x128xf32> to vector<1x128xf32>
    %6 = vector.broadcast %5 : vector<1x128xf32> to vector<128x128xf32>
    %7 = arith.mulf %3, %6 : vector<128x128xf32>
    %c0_7 = arith.constant 0 : index
    %c0_8 = arith.constant 0 : index
    %c0_9 = arith.constant 0 : index
    %8 = vector.load %arg5[%c0_7, %c0_8, %c0_9] : memref<1x1x128xf32, #tpu.memory_space<vmem>>, vector<1x1x128xf32>
    %9 = vector.shape_cast %8 : vector<1x1x128xf32> to vector<1x128xf32>
    %10 = vector.broadcast %9 : vector<1x128xf32> to vector<128x128xf32>
    %11 = arith.addf %7, %10 : vector<128x128xf32>
    %cst_10 = arith.constant 0.000000e+00 : f32
    %12 = vector.broadcast %cst_10 : f32 to vector<128x128xf32>
    %13 = arith.maximumf %11, %12 : vector<128x128xf32>
    %14 = arith.truncf %13 : vector<128x128xf32> to vector<128x128xbf16>
    %c0_11 = arith.constant 0 : index
    %c0_12 = arith.constant 0 : index
    %15 = vector.load %arg6[%c0_11, %c0_12] : memref<128x128xbf16, #tpu.memory_space<vmem>>, vector<128x128xbf16>
    %cst_13 = arith.constant dense<0.000000e+00> : vector<128x128xf32>
    %16 = tpu.matmul %14, %15, %cst_13 {dimension_numbers = #tpu.dot_dimension_numbers<[1], [0], [0], [1], [0, 0, 1, 1], [], []>} : vector<128x128xbf16>, vector<128x128xbf16>, vector<128x128xf32> -> vector<128x128xf32>
    %c0_14 = arith.constant 0 : index
    %c0_15 = arith.constant 0 : index
    %c0_16 = arith.constant 0 : index
    %17 = vector.load %arg7[%c0_14, %c0_15, %c0_16] : memref<1x1x128xf32, #tpu.memory_space<vmem>>, vector<1x1x128xf32>
    %18 = vector.shape_cast %17 : vector<1x1x128xf32> to vector<1x128xf32>
    %19 = vector.broadcast %18 : vector<1x128xf32> to vector<128x128xf32>
    %20 = arith.mulf %16, %19 : vector<128x128xf32>
    %c0_17 = arith.constant 0 : index
    %c0_18 = arith.constant 0 : index
    %c0_19 = arith.constant 0 : index
    %21 = vector.load %arg8[%c0_17, %c0_18, %c0_19] : memref<1x1x128xf32, #tpu.memory_space<vmem>>, vector<1x1x128xf32>
    %22 = vector.shape_cast %21 : vector<1x1x128xf32> to vector<1x128xf32>
    %23 = vector.broadcast %22 : vector<1x128xf32> to vector<128x128xf32>
    %24 = arith.addf %20, %23 : vector<128x128xf32>
    %cst_20 = arith.constant 0.000000e+00 : f32
    %25 = vector.broadcast %cst_20 : f32 to vector<128x128xf32>
    %26 = arith.maximumf %24, %25 : vector<128x128xf32>
    %27 = arith.truncf %26 : vector<128x128xf32> to vector<128x128xbf16>
    %c0_21 = arith.constant 0 : index
    %c0_22 = arith.constant 0 : index
    %c0_23 = arith.constant 0 : index
    %28 = vector.load %arg9[%c0_21, %c0_22, %c0_23] : memref<1x128x128xbf16, #tpu.memory_space<vmem>>, vector<1x128x128xbf16>
    %29 = vector.shape_cast %28 : vector<1x128x128xbf16> to vector<128x128xbf16>
    %30 = vector.shape_cast %27 : vector<128x128xbf16> to vector<1x128x128xbf16>
    tpu.vector_store %arg9[%c0_21, %c0_22, %c0_23], %30 {strides = array<i32>} : memref<1x128x128xbf16, #tpu.memory_space<vmem>>, vector<1x128x128xbf16>,
    return
  }
  func.func @transform_0(%arg0: i32, %arg1: i32) -> (i32, i32, i32) {
    %c0_i32 = arith.constant 0 : i32
    %c0_i32_0 = arith.constant 0 : i32
    return %arg0, %arg1, %c0_i32 : i32, i32, i32
  }
  func.func @transform_1(%arg0: i32, %arg1: i32) -> (i32, i32) {
    %c0_i32 = arith.constant 0 : i32
    %c0_i32_0 = arith.constant 0 : i32
    %c0_i32_1 = arith.constant 0 : i32
    return %c0_i32, %c0_i32_0 : i32, i32
  }
  func.func @transform_2(%arg0: i32, %arg1: i32) -> (i32, i32, i32) {
    %c0_i32 = arith.constant 0 : i32
    %c0_i32_0 = arith.constant 0 : i32
    %c0_i32_1 = arith.constant 0 : i32
    return %arg0, %c0_i32, %c0_i32_0 : i32, i32, i32
  }
  func.func @transform_3(%arg0: i32, %arg1: i32) -> (i32, i32, i32) {
    %c0_i32 = arith.constant 0 : i32
    %c0_i32_0 = arith.constant 0 : i32
    %c0_i32_1 = arith.constant 0 : i32
    return %arg0, %c0_i32, %c0_i32_0 : i32, i32, i32
  }
  func.func @transform_4(%arg0: i32, %arg1: i32) -> (i32, i32) {
    %c0_i32 = arith.constant 0 : i32
    %c0_i32_0 = arith.constant 0 : i32
    %c0_i32_1 = arith.constant 0 : i32
    return %c0_i32, %c0_i32_0 : i32, i32
  }
  func.func @transform_5(%arg0: i32, %arg1: i32) -> (i32, i32, i32) {
    %c0_i32 = arith.constant 0 : i32
    %c0_i32_0 = arith.constant 0 : i32
    %c0_i32_1 = arith.constant 0 : i32
    return %arg0, %c0_i32, %c0_i32_0 : i32, i32, i32
  }
  func.func @transform_6(%arg0: i32, %arg1: i32) -> (i32, i32, i32) {
    %c0_i32 = arith.constant 0 : i32
    %c0_i32_0 = arith.constant 0 : i32
    %c0_i32_1 = arith.constant 0 : i32
    return %arg0, %c0_i32, %c0_i32_0 : i32, i32, i32
  }
  func.func @transform_7(%arg0: i32, %arg1: i32) -> (i32, i32, i32) {
    %c0_i32 = arith.constant 0 : i32
    %c0_i32_0 = arith.constant 0 : i32
    return %arg0, %arg1, %c0_i32 : i32, i32, i32
  }
}

</mosaic_0001>

<bundles_post_ra>
// kernel: tpu_custom_call.1
= control target key start
LH: loop header
LB: loop body
LE: loop exit
PB: predicated region body
PF: predicated region fallthrough
CT: control target
= control target key end

     0   :  { %s2085_s0 = inlined_call_operand.hbm [shape: bf16[2,256,128], index: 0, kind: input, shape index: {}]   ;;  %s2086_s1 = inlined_call_operand.hbm [shape: bf16[128,128], index: 1, kind: input, shape index: {}]   ;;  %s2087_s2 = inlined_call_operand.vmem [shape: f32[2,1,128], index: 2, kind: input, shape index: {}]   ;;  %s2088_s3 = inlined_call_operand.vmem [shape: f32[2,1,128], index: 3, kind: input, shape index: {}]   ;;  %s2089_s4 = inlined_call_operand.hbm [shape: bf16[128,128], index: 4, kind: input, shape index: {}]   ;;  %s2090_s5 = inlined_call_operand.vmem [shape: f32[2,1,128], index: 5, kind: input, shape index: {}]   ;;  %s2091_s6 = inlined_call_operand.vmem [shape: f32[2,1,128], index: 6, kind: input, shape index: {}]   ;;  %s2092_s7 = inlined_call_operand.hbm [shape: bf16[2,256,128], index: 7, kind: output, shape index: {}]  }
   0x1   :  { %2102 = sst [smem:[#allocation17_spill]] %s2086_s1 }
   0x2   :  { %2103 = sst [smem:[#allocation18_spill]] %s2089_s4 }
   0x3   :  { %2104 = sst [smem:[#allocation19_spill]] %s2090_s5 }
   0x4   :  { %2105 = sst [smem:[#allocation20_spill]] %s2091_s6 }
   0x5   :  { %2106 = sst [smem:[#allocation21_spill]] %s2092_s7 }
   0x6   :  { %12 = vsyncpa [#allocation3], 0 }
   0x7   :  { %14 = vsyncpa [#allocation3 + $0x1], 0 }
   0x8   :  { %15 = vsyncpa [#allocation6], 0 }
   0x9   :  { %16 = vsyncpa [#allocation4], 0 }
   0xa   :  { %18 = vsyncpa [#allocation4 + $0x1], 0  ;;  %s1743_s24 = smov 0   ;;  %s1745_s25 = smov 0  }
   0xb   :  { %s1747_s26 = smov 0   ;;  %s1749_s27 = smov 0  }
   0xc   :  { %s1751_s28 = smov 0   ;;  %s1753_s29 = smov 0  }
   0xd   :  { %s1755_s30 = smov 0   ;;  %s1757_s8 = smov 0  }
   0xe LB: > { %2107 = sst [smem:[#allocation12_spill]] %s1665_s24  ;;  %s1162_s9 = sadd.s32 4294967295, %s1693_s8   ;;  %s1693_s8 = sphi %s1757_s8, %s24_s8   ;;  %s1689_s30 = sphi %s1755_s30, %s2142_s30   ;;  %s1685_s29 = sphi %s1753_s29, %s2141_s29   ;;  %s1681_s28 = sphi %s1751_s28, %s2140_s28   ;;  %s1677_s27 = sphi %s1749_s27, %s2139_s27   ;;  %s1673_s26 = sphi %s1747_s26, %s2138_s26   ;;  %s1669_s25 = sphi %s1745_s25, %s2137_s25   ;;  %s1665_s24 = sphi %s1743_s24, %s2136_s24  }
   0xf   : > { %2108 = sst [smem:[#allocation13_spill]] %s1677_s27  ;;  %s1163_s10 = sadd.s32 4294967294, %s1693_s8  }
  0x10   : > { %p58_p0 = scmp.ne.s32.totalorder %s1669_s25, %s1665_s24  ;;  %p1787_p1 = scmp.eq.s32.totalorder %s1162_s9, 0 }
  0x11   : > { %p1791_p2 = scmp.eq.s32.totalorder %s1162_s9, 3  ;;  %p236_p3 = scmp.eq.s32.totalorder %s1163_s10, 3 }
  0x12   : > { %p1797_p4 = por %p1787_p1, %p58_p0  ;;  %p1164_p5 = scmp.ge.s32.totalorder %s1693_s8, 1 }
  0x13   : > { %p1802_p6 = por %p236_p3, %p58_p0  ;;  %p243_p7 = scmp.lt.s32.totalorder %s1693_s8, 5 }
  0x14   : > { %s1695_s16 = smov [#allocation5]   ;;  %s1696_s19 = smov [#allocation7]  }
  0x15   : > { %s2112_s14 = scalar_select %p1802_p6, 1, 0 }
  0x16   : > { %p1807_p8 = pnand %p1164_p5, %p243_p7  ;;  %s255_s17 = sshll.u32 %s1695_s16, 4  ;;  %s256_s17 = int_to_ptr.vmem [resolvable:$true] %s255_s17 }
  0x17   : > { %2113 = sst [smem:[#allocation14_spill]] %s2112_s14  ;;  %s268_s20 = sshll.u32 %s1696_s19, 4  ;;  %s269_s20 = int_to_ptr.vmem [resolvable:$true] %s268_s20 }
  0x18   : > { %p1398_p9 = pneg %p1807_p8  ;;  %s1524_s21 = scalar_lea.vmem %s256_s17, 1024 }
  0x19   : > { %p1525_p12 = scmp.ne.s32.totalorder %s256_s17, %s1524_s21  ;;  %p1532_p3 = scmp.lt.s32.totalorder %s256_s17, %s256_s17 }
  0x1a   : > { %p1815_p10 = pnand %p1398_p9, %p1787_p1  ;;  %p1533_p5 = scmp.lt.s32.totalorder %s1524_s21, %s1524_s21 }
  0x1c   : > { %p1515_p11 = pneg %p1815_p10  ;;  %p1534_p7 = por %p1533_p5, %p1532_p3 }
  0x1e   : > { %p1527_p13 = pnand %p1525_p12, %p1515_p11 }
  0x20   : > { %p1528_p0 = pneg %p1527_p13 }
  0x22   : > { %p1535_p9 = pnand %p1534_p7, %p1528_p0 }
  0x24   : > { %1538 = shalt.err (!%p1535_p9)
}
  0x25   : > { %s2093_s22 = smov 64   ;;  %s2094_s23 = smov 4  }
  0x26   : > { %s2116_s1 = sld [smem:[#allocation17_spill]]  ;;  %s1550_s16 = scalar_lea.vmem %s269_s20, 1024 }
  0x27   : > { %p1551_p12 = scmp.ne.s32.totalorder %s269_s20, %s1550_s16  ;;  %p1558_p0 = scmp.lt.s32.totalorder %s269_s20, %s269_s20 }
  0x28   : > { %p1559_p5 = scmp.lt.s32.totalorder %s1550_s16, %s1550_s16 }
  0x29   : > { %p1553_p13 = pnand %p1551_p12, %p1515_p11 }
  0x2a   : > { %p1560_p7 = por %p1559_p5, %p1558_p0 }
  0x2b   : > { %p1554_p3 = pneg %p1553_p13 }
  0x2c   : > { %1401 = dma.hbm_to_vmem [thread:$0]  (!%p1815_p10), %s2116_s1, 1024, %s256_s17, [#allocation6], %s2093_s22, %s2093_s22, %s2094_s23  }
  0x2d   : > { %p1561_p9 = pnand %p1560_p7, %p1554_p3 }
  0x2f   : > { %1564 = shalt.err (!%p1561_p9)
}
  0x30   : > { %s2117_s4 = sld [smem:[#allocation18_spill]]  ;;  %s33_s17 = sadd.s32 1, %s1685_s29 }
  0x31   : > { %s36_s18 = sadd.s32 1, %s1689_s30  ;;  %p34_p11 = scmp.ge.s32.totalorder %s33_s17, 2 }
  0x32   : > { %s45_s9 = sadd.s32 1, %s1673_s26  ;;  %p52_p12 = scmp.ne.s32.totalorder %s1673_s26, %s1669_s25 }
  0x33   : > { %p53_p13 = scmp.eq.s32.totalorder %s1693_s8, 0  ;;  %s2144_s17 = smov (%p34_p11, %s33_s17), 0 }
  0x34   : > { %2118 = sst [smem:[#allocation15_spill]] %s2144_s17  ;;  %s2146_s18 = smov (!%p34_p11, %s36_s18), %s1689_s30 }
  0x35   : > { %s41_s10 = ssub.s32 %s1685_s29, %s2144_s17  ;;  %p1854_p3 = por %p53_p13, %p52_p12 }
  0x36   : > { %1404 = dma.hbm_to_vmem [thread:$0]  (!%p1815_p10), %s2117_s4, 1024, %s269_s20, [#allocation6], %s2093_s22, %s2093_s22, %s2094_s23  }
  0x37   : > { %p38_p10 = scmp.ge.s32.totalorder %s2146_s18, 2  ;;  %p1860_p0 = por %p1791_p2, %p52_p12 }
  0x38   : > { %p1415_p5 = scmp.lt.s32.totalorder %s1693_s8, 4  ;;  %s282_s19 = sand.u32 1, %s1673_s26  }
  0x39   : > { %s2120_s20 = scalar_select %p1860_p0, 1, 0 }
  0x3a   : > { %s2148_s18 = smov (%p38_p10, %s2146_s18), 0  ;;  %s1168_s21 = sshll.u32 %s282_s19, 6 }
  0x3b   : > { %2121 = sst [smem:[#allocation16_spill]] %s2120_s20  ;;  %s40_s22 = ssub.s32 %s1689_s30, %s2148_s18 }
  0x3c   : > { %s42_s23 = sor.u32 %s41_s10, %s40_s22  ;;  %s1169_s1 = sshll.u32 %s1685_s29, 4 }
  0x3d   : > { %p43_p7 = scmp.eq.s32.totalorder %s42_s23, 0  ;;  %s1170_s4 = sshll.u32 %s1689_s30, 5 }
  0x3e   : > { %s292_s17 = sadd.s32 %s1170_s4, %s1169_s1  ;;  %s286_s14 = scalar_lea.vmem [#allocation2], %s1168_s21 }
  0x3f   : > { %s295_s12 = sshll.u32 %s286_s14, 4  ;;  %s1171_s7 = sshll.u32 %s292_s17, 6  ;;  %s296_s12 = int_to_ptr.vmem [resolvable:$true] %s295_s12 }
  0x40   : > { %s1873_s24 = scalar_select %p43_p7, %s1673_s26, %s45_s9  }
  0x41   : > { %s294_s6 = scalar_lea.hbm %s2085_s0, %s1171_s7  ;;  %p1882_p2 = pnand %p1415_p5, %p1854_p3 }
  0x42   : > { %s283_s22 = scalar_lea.sflag [#allocation3], %s282_s19  ;;  %s1578_s1 = scalar_lea.vmem %s296_s12, 1024 }
  0x43   : > { %p1567_p9 = pneg %p1882_p2  ;;  %p1579_p11 = scmp.ne.s32.totalorder %s296_s12, %s1578_s1 }
  0x44   : > { %s1699_s4 = smov [#allocation2]  }
  0x45   : > { %p1581_p12 = pnand %p1579_p11, %p1567_p9  ;;  %s1583_s14 = sshll.u32 %s1699_s4, 4  ;;  %s1584_s14 = int_to_ptr.vmem [resolvable:$false] %s1583_s14 }
  0x46   : > { %s1585_s23 = scalar_lea.vmem %s1584_s14, 2048  ;;  %p1586_p10 = scmp.lt.s32.totalorder %s296_s12, %s1584_s14 }
  0x47   : > { %p1582_p13 = pneg %p1581_p12  ;;  %p1587_p7 = scmp.lt.s32.totalorder %s1585_s23, %s1578_s1 }
  0x49   : > { %p1588_p6 = por %p1587_p7, %p1586_p10 }
  0x4b   : > { %p1589_p0 = pnand %p1588_p6, %p1582_p13 }
  0x4d   : > { %1592 = shalt.err (!%p1589_p0)
}
  0x4e   : > { %s2123_s7 = smov 4   ;;  %s2124_s27 = smov 64  }
  0x4f   : > { %1408 = dma.hbm_to_vmem [thread:$0]  (!%p1882_p2), %s294_s6, 1024, %s296_s12, %s283_s22, %s2124_s27, %s2124_s27, %s2123_s7  }
  0x50   : > { %331 = sbr.rel (%p1807_p8) target bundleno = 574 (0x23e), region = 48  ;;  %s1896_s17 = sand.u32 (!%p1807_p8), 1, %s1669_s25  }
  0x51   : > { %s1173_s9 = sshll.u32 (!%p1807_p8), %s1896_s17, 6  ;;  %s334_s10 = scalar_lea.sflag (!%p1807_p8), [#allocation3], %s1896_s17 }
  0x52   : > { %s1902_s16 = scalar_lea.vmem (!%p1807_p8), [#allocation2], %s1173_s9 }
  0x55   : > { %1652 = dma.done.wait (%p1797_p4), %s334_s10, 1024  }
  0x56   : > { %1654 = vsyncadd (%p1797_p4), %s334_s10, 4294966272 }
  0x57   : > { %1656 = dma.done.wait (%p1787_p1), [#allocation6], 2048  }
  0x58   : > { %1658 = vsyncadd (%p1787_p1), [#allocation6], 4294965248  ;;  %v1489_v0 = vld [vmem:[#allocation5 + $0x38] sm:$0xff]   ;;  %v1490_v1 = vld [vmem:[#allocation5 + $0x30] sm:$0xff]   ;;  %p389_p1 = scmp.lt.s32.totalorder %s1681_s28, 1  ;;  %s2125_s22 = sld [smem:[#allocation19_spill]] }
  0x59   : > { %1322 = vmatprep.subr.bf16.mxu0 %v1489_v0  ;;  %v1491_v2 = vld [vmem:[#allocation5 + $0x28] sm:$0xff]   ;;  %v1492_v3 = vld [vmem:[#allocation5 + $0x20] sm:$0xff]   ;;  %v1493_v5 = vld [vmem:[#allocation5 + $0x18] sm:$0xff]   ;;  %s2126_s23 = sld [smem:[#allocation20_spill]]  ;;  %s1992_s27 = scalar_lea.vmem [#allocation8], %s1173_s9 }
  0x5a   : > { %1323 = vmatpush3.bf16.msra.mxu0 %v1489_v0  ;;  %v1497_v4 = vld [vmem:[%s1902_s16] sm:$0xff]   ;;  %v1494_v6 = vld [vmem:[#allocation5 + $0x10] sm:$0xff]   ;;  %v1505_v7 = vld [vmem:[#allocation7 + $0x38] sm:$0xff]   ;;  %s1922_s5 = scalar_select %p389_p1, %s1681_s28, 1 }
  0x5b   : > { %1324 = vmatprep.subr.bf16.mxu0 %v1490_v1  ;;  %1338 = vmatprep.mubr.bf16.mxu0 %v1497_v4  ;;  %v1506_v8 = vld [vmem:[#allocation7 + $0x30] sm:$0xff]   ;;  %v1495_v9 = vld [vmem:[#allocation5 + $0x8] sm:$0xff]   ;;  %v1496_v11 = vld [vmem:[#allocation5] sm:$0xff]   ;;  %s2127_s9 = sld [smem:[#allocation13_spill]]  ;;  %s1017_s11 = sshll.u32 %s1992_s27, 4  ;;  %s2030_s11 = int_to_ptr.vmem [resolvable:$true] %s1017_s11 }
  0x5c   : > { %1354 = vmatprep.subr.bf16.mxu1 %v1505_v7  ;;  %v1507_v10 = vld [vmem:[#allocation7 + $0x28] sm:$0xff]   ;;  %v1508_v12 = vld [vmem:[#allocation7 + $0x20] sm:$0xff]   ;;  %v1499_v14 = vld [vmem:[%s1902_s16 + $0x10] sm:$0xff]   ;;  %s391_s13 = scalar_lea.vmem %s2087_s2, %s1922_s5  ;;  %s394_s19 = scalar_lea.vmem %s2088_s3, %s1922_s5 }
  0x5d   : > { %1355 = vmatpush3.bf16.msra.mxu1 %v1505_v7  ;;  %v1498_v13 = vld [vmem:[%s1902_s16 + $0x8] sm:$0xff]   ;;  %v1500_v15 = vld [vmem:[%s1902_s16 + $0x18] sm:$0xff]   ;;  %v1501_v16 = vld [vmem:[%s1902_s16 + $0x20] sm:$0xff]   ;;  %s2129_s20 = sld [smem:[#allocation21_spill]]  ;;  %s1002_s21 = scalar_lea.sflag [#allocation4], %s1896_s17 }
  0x5e   : > { %1325 = vmatpush3.bf16.msra.mxu0 %v1490_v1  ;;  %1356 = vmatprep.subr.bf16.mxu1 %v1506_v8  ;;  %v1502_v17 = vld [vmem:[%s1902_s16 + $0x28] sm:$0xff]   ;;  %v1503_v18 = vld [vmem:[%s1902_s16 + $0x30] sm:$0xff]   ;;  %v1504_v19 = vld [vmem:[%s1902_s16 + $0x38] sm:$0xff]   ;;  %s397_s1 = scalar_lea.vmem %s2125_s22, %s1922_s5  ;;  %s1223_s16 = sshll.u32 %s1681_s28, 5 }
  0x5f   : > { %1326 = vmatprep.subr.bf16.mxu0 %v1491_v2  ;;  %v1509_v20 = vld [vmem:[#allocation7 + $0x18] sm:$0xff]   ;;  %v1510_v21 = vld [vmem:[#allocation7 + $0x10] sm:$0xff]   ;;  %v1511_v22 = vld [vmem:[#allocation7 + $0x8] sm:$0xff]   ;;  %s400_s7 = scalar_lea.vmem %s2126_s23, %s1922_s5  ;;  %s2128_s28 = sld [smem:[#allocation16_spill]] }
  0x60   : > { %v1512_v23 = vld [vmem:[#allocation7] sm:$0xff]   ;;  %s1593_s12 = scalar_lea.vmem %s2030_s11, 1024  ;;  %s1700_s22 = smov [#allocation8]  }
  0x61   : > { %1357 = vmatpush3.bf16.msra.mxu1 %v1506_v8  ;;  %v1928_v25 = vld [vmem:[%s391_s13] ss:$0 sm:$0xff]  ;;  %s1222_s10 = sshll.u32 %s2127_s9, 4  ;;  %p1594_p4 = scmp.ne.s32.totalorder %s2030_s11, %s1593_s12 }
  0x62   : > { %1327 = vmatpush3.bf16.msra.mxu0 %v1491_v2  ;;  %1358 = vmatprep.subr.bf16.mxu1 %v1507_v10  ;;  %v1936_v30 = vld [vmem:[%s394_s19] ss:$0 sm:$0xff]  ;;  %s1014_s5 = sadd.s32 %s1223_s16, %s1222_s10 }
  0x63   : > { %1328 = vmatprep.subr.bf16.mxu0 %v1492_v3  ;;  %s1224_s6 = sshll.u32 %s1014_s5, 6 }
  0x64   : > { %s2028_s19 = scalar_lea.hbm %s2129_s20, %s1224_s6 }
  0x65   : > { %1359 = vmatpush3.bf16.msra.mxu1 %v1507_v10  ;;  %p2130_p6 = scmp.ne.s32.totalorder %s2128_s28, 0 }
  0x66   : > { %1329 = vmatpush3.bf16.msra.mxu0 %v1492_v3  ;;  %1360 = vmatprep.subr.bf16.mxu1 %v1508_v12 }
  0x67   : > { %1330 = vmatprep.subr.bf16.mxu0 %v1493_v5  ;;  %p1595_p8 = pnand %p1594_p4, %p2130_p6 }
  0x69   : > { %1361 = vmatpush3.bf16.msra.mxu1 %v1508_v12  ;;  %p1596_p3 = pneg %p1595_p8 }
  0x6a   : > { %1331 = vmatpush3.bf16.msra.mxu0 %v1493_v5  ;;  %1362 = vmatprep.subr.bf16.mxu1 %v1509_v20 }
  0x6b   : > { %1332 = vmatprep.subr.bf16.mxu0 %v1494_v6 }
  0x6d   : > { %1363 = vmatpush3.bf16.msra.mxu1 %v1509_v20 }
  0x6e   : > { %1333 = vmatpush3.bf16.msra.mxu0 %v1494_v6  ;;  %1364 = vmatprep.subr.bf16.mxu1 %v1510_v21 }
  0x6f   : > { %1334 = vmatprep.subr.bf16.mxu0 %v1495_v9 }
  0x71   : > { %1365 = vmatpush3.bf16.msra.mxu1 %v1510_v21 }
  0x72   : > { %1335 = vmatpush3.bf16.msra.mxu0 %v1495_v9  ;;  %1366 = vmatprep.subr.bf16.mxu1 %v1511_v22 }
  0x73   : > { %1336 = vmatprep.subr.bf16.mxu0 %v1496_v11 }
  0x75   : > { %1367 = vmatpush3.bf16.msra.mxu1 %v1511_v22 }
  0x76   : > { %1337 = vmatpush3.bf16.msra.mxu0 %v1496_v11  ;;  %1368 = vmatprep.subr.bf16.mxu1 %v1512_v23 }
  0x79   : > { %1339 = vmatmul.mubr.bf16.vlgmr.msra.gmra.mxu0 %v1498_v13  ;;  %1369 = vmatpush3.bf16.msra.mxu1 %v1512_v23 }
  0x7a   : > { %1342 = vmatprep.mubr.bf16.mxu0 %v1499_v14 }
  0x81   : > { %1343 = vmatmul.mubr.bf16.gmra.mxu0 %v1500_v15 }
  0x82   : > { %1346 = vmatprep.mubr.bf16.mxu0 %v1501_v16 }
  0x89   : > { %1347 = vmatmul.mubr.bf16.gmra.mxu0 %v1502_v17 }
  0x8a   : > { %1350 = vmatprep.mubr.bf16.mxu0 %v1503_v18 }
  0x91   : > { %1351 = vmatmul.mubr.bf16.gmra.mxu0 %v1504_v19 }
 0x139   : > { %v1340_v24 = vpop.f32.mrf.mxu0 }
 0x13a   : > { %v637_v28 = vmul.f32 %v1340_v24, %v1928_v25 }
 0x13b   : > { %v565_v26 = vpop.f32.mrf.mxu0 }
 0x13c   : > { %v635_v27 = vmul.f32 %v1928_v25, %v565_v26  ;;  %v660_v36 = vadd.f32 %v1936_v30, %v637_v28 }
 0x13d   : > { %v1341_v29 = vpop.f32.mrf.mxu0 }
 0x13e   : > { %v638_v31 = vmul.f32 %v1341_v29, %v1928_v25  ;;  %v658_v35 = vadd.f32 %v1936_v30, %v635_v27  ;;  %v676_v44 = vmax.f32 %v660_v36, 0.0  ;;  %v1972_v36 = vld [vmem:[%s397_s1] ss:$0 sm:$0xff]  ;;  %s1597_s1 = sshll.u32 %s1700_s22, 4  ;;  %s1598_s1 = int_to_ptr.vmem [resolvable:$false] %s1597_s1 }
 0x13f   : > { %v568_v32 = vpop.f32.mrf.mxu0  ;;  %s1599_s4 = scalar_lea.vmem %s1598_s1, 2048  ;;  %p1600_p0 = scmp.lt.s32.totalorder %s2030_s11, %s1598_s1 }
 0x140   : > { %v661_v33 = vadd.f32 %v1936_v30, %v638_v31  ;;  %v636_v34 = vmul.f32 %v1928_v25, %v568_v32  ;;  %v674_v42 = vmax.f32 %v658_v35, 0.0  ;;  %p1601_p5 = scmp.lt.s32.totalorder %s1599_s4, %s1593_s12 }
 0x141   : > { %v1344_v37 = vpop.f32.mrf.mxu0 }
 0x142   : > { %v659_v38 = vadd.f32 %v1936_v30, %v636_v34  ;;  %v677_v39 = vmax.f32 %v661_v33, 0.0  ;;  %v641_v45 = vmul.f32 %v1344_v37, %v1928_v25  ;;  %v1979_v37 = vld [vmem:[%s400_s7] ss:$0 sm:$0xff]  ;;  %p1602_p2 = por %p1601_p5, %p1600_p0 }
 0x143   : > { %v581_v40 = vpop.f32.mrf.mxu0 }
 0x144   : > { %v639_v41 = vmul.f32 %v1928_v25, %v581_v40  ;;  %v675_v43 = vmax.f32 %v659_v38, 0.0  ;;  %v691_v50 = vpack.c.bf16 %v677_v39, %v676_v44  ;;  %v664_v54 = vadd.f32 %v1936_v30, %v641_v45  ;;  %p1603_p9 = pnand %p1602_p2, %p1596_p3 }
 0x145   : > { %v1345_v46 = vpop.f32.mrf.mxu0 }
 0x146   : > { %v642_v47 = vmul.f32 %v1345_v46, %v1928_v25  ;;  %v690_v48 = vpack.c.bf16 %v675_v43, %v674_v42  ;;  %v662_v51 = vadd.f32 %v1936_v30, %v639_v41  ;;  %v680_v62 = vmax.f32 %v664_v54, 0.0 }
 0x147   : > { %v584_v49 = vpop.f32.mrf.mxu0 }
 0x148   : > { %v665_v52 = vadd.f32 %v1936_v30, %v642_v47  ;;  %v640_v53 = vmul.f32 %v1928_v25, %v584_v49  ;;  %1370 = vmatprep.mubr.bf16.mxu1 %v690_v48  ;;  %v678_v59 = vmax.f32 %v662_v51, 0.0 }
 0x149   : > { %v1348_v55 = vpop.f32.mrf.mxu0  ;;  %1371 = vmatmul.mubr.bf16.vlgmr.msra.gmra.mxu1 %v691_v50 }
 0x14a   : > { %v663_v56 = vadd.f32 %v1936_v30, %v640_v53  ;;  %v681_v57 = vmax.f32 %v665_v52, 0.0  ;;  %v645_v63 = vmul.f32 %v1348_v55, %v1928_v25 }
 0x14b   : > { %v597_v58 = vpop.f32.mrf.mxu0 }
 0x14c   : > { %v679_v60 = vmax.f32 %v663_v56, 0.0  ;;  %v643_v61 = vmul.f32 %v1928_v25, %v597_v58  ;;  %v693_v4 = vpack.c.bf16 %v681_v57, %v680_v62  ;;  %v668_v8 = vadd.f32 %v1936_v30, %v645_v63 }
 0x14d   : > { %v1349_v0 = vpop.f32.mrf.mxu0 }
 0x14e   : > { %v646_v1 = vmul.f32 %v1349_v0, %v1928_v25  ;;  %v692_v2 = vpack.c.bf16 %v679_v60, %v678_v59  ;;  %v666_v5 = vadd.f32 %v1936_v30, %v643_v61  ;;  %v684_v16 = vmax.f32 %v668_v8, 0.0 }
 0x14f   : > { %v600_v3 = vpop.f32.mrf.mxu0 }
 0x150   : > { %v669_v6 = vadd.f32 %v1936_v30, %v646_v1  ;;  %v644_v7 = vmul.f32 %v1928_v25, %v600_v3  ;;  %1374 = vmatprep.mubr.bf16.mxu1 %v692_v2  ;;  %v682_v13 = vmax.f32 %v666_v5, 0.0 }
 0x151   : > { %v1352_v9 = vpop.f32.mrf.mxu0  ;;  %1375 = vmatmul.mubr.bf16.gmra.mxu1 %v693_v4 }
 0x152   : > { %v667_v10 = vadd.f32 %v1936_v30, %v644_v7  ;;  %v685_v11 = vmax.f32 %v669_v6, 0.0  ;;  %v649_v17 = vmul.f32 %v1352_v9, %v1928_v25 }
 0x153   : > { %v613_v12 = vpop.f32.mrf.mxu0 }
 0x154   : > { %v683_v14 = vmax.f32 %v667_v10, 0.0  ;;  %v647_v15 = vmul.f32 %v1928_v25, %v613_v12  ;;  %v695_v22 = vpack.c.bf16 %v685_v11, %v684_v16  ;;  %v672_v27 = vadd.f32 %v1936_v30, %v649_v17 }
 0x155   : > { %v1353_v18 = vpop.f32.mrf.mxu0 }
 0x156   : > { %v650_v19 = vmul.f32 %v1353_v18, %v1928_v25  ;;  %v694_v20 = vpack.c.bf16 %v683_v14, %v682_v13  ;;  %v670_v23 = vadd.f32 %v1936_v30, %v647_v15  ;;  %v688_v33 = vmax.f32 %v672_v27, 0.0 }
 0x157   : > { %v616_v21 = vpop.f32.mrf.mxu0 }
 0x158   : > { %v673_v24 = vadd.f32 %v1936_v30, %v650_v19  ;;  %v648_v26 = vmul.f32 %v1928_v25, %v616_v21  ;;  %1378 = vmatprep.mubr.bf16.mxu1 %v694_v20  ;;  %v686_v31 = vmax.f32 %v670_v23, 0.0 }
 0x159   : > { %1379 = vmatmul.mubr.bf16.gmra.mxu1 %v695_v22 }
 0x15a   : > { %v671_v28 = vadd.f32 %v1936_v30, %v648_v26  ;;  %v689_v29 = vmax.f32 %v673_v24, 0.0 }
 0x15c   : > { %v687_v32 = vmax.f32 %v671_v28, 0.0  ;;  %v697_v35 = vpack.c.bf16 %v689_v29, %v688_v33 }
 0x15e   : > { %v696_v34 = vpack.c.bf16 %v687_v32, %v686_v31 }
 0x160   : > { %1382 = vmatprep.mubr.bf16.mxu1 %v696_v34 }
 0x161   : > { %1383 = vmatmul.mubr.bf16.gmra.mxu1 %v697_v35 }
 0x209   : > { %v1372_v25 = vpop.f32.mrf.mxu1 }
 0x20a   : > { %v868_v30 = vmul.f32 %v1372_v25, %v1972_v36 }
 0x20b   : > { %v796_v38 = vpop.f32.mrf.mxu1 }
 0x20c   : > { %v866_v39 = vmul.f32 %v1972_v36, %v796_v38  ;;  %v891_v41 = vadd.f32 %v1979_v37, %v868_v30 }
 0x20d   : > { %v1373_v40 = vpop.f32.mrf.mxu1 }
 0x20e   : > { %v869_v42 = vmul.f32 %v1373_v40, %v1972_v36  ;;  %v889_v44 = vadd.f32 %v1979_v37, %v866_v39  ;;  %v907_v48 = vmax.f32 %v891_v41, 0.0 }
 0x20f   : > { %v799_v43 = vpop.f32.mrf.mxu1 }
 0x210   : > { %v892_v45 = vadd.f32 %v1979_v37, %v869_v42  ;;  %v867_v46 = vmul.f32 %v1972_v36, %v799_v43  ;;  %v905_v53 = vmax.f32 %v889_v44, 0.0 }
 0x211   : > { %v1376_v47 = vpop.f32.mrf.mxu1 }
 0x212   : > { %v908_v49 = vmax.f32 %v892_v45, 0.0  ;;  %v890_v50 = vadd.f32 %v1979_v37, %v867_v46  ;;  %v872_v51 = vmul.f32 %v1376_v47, %v1972_v36 }
 0x213   : > { %v812_v52 = vpop.f32.mrf.mxu1 }
 0x214   : > { %v1251_v54 = vpack.c.bf16 %v908_v49, %v907_v48  ;;  %v906_v55 = vmax.f32 %v890_v50, 0.0  ;;  %v870_v56 = vmul.f32 %v1972_v36, %v812_v52  ;;  %v895_v59 = vadd.f32 %v1979_v37, %v872_v51 }
 0x215   : > { %v1377_v57 = vpop.f32.mrf.mxu1 }
 0x216   : > { %1283 = vst [vmem:[%s1992_s27 + $0x8] sm:$0xff] %v1251_v54   ;;  %v1246_v58 = vpack.c.bf16 %v906_v55, %v905_v53  ;;  %v873_v60 = vmul.f32 %v1377_v57, %v1972_v36  ;;  %v893_v62 = vadd.f32 %v1979_v37, %v870_v56  ;;  %v911_v2 = vmax.f32 %v895_v59, 0.0 }
 0x217   : > { %v815_v61 = vpop.f32.mrf.mxu1 }
 0x218   : > { %1247 = vst [vmem:[%s1992_s27] sm:$0xff] %v1246_v58   ;;  %v896_v63 = vadd.f32 %v1979_v37, %v873_v60  ;;  %v871_v0 = vmul.f32 %v1972_v36, %v815_v61  ;;  %v909_v7 = vmax.f32 %v893_v62, 0.0 }
 0x219   : > { %v1380_v1 = vpop.f32.mrf.mxu1 }
 0x21a   : > { %v912_v3 = vmax.f32 %v896_v63, 0.0  ;;  %v894_v4 = vadd.f32 %v1979_v37, %v871_v0  ;;  %v876_v5 = vmul.f32 %v1380_v1, %v1972_v36 }
 0x21b   : > { %v828_v6 = vpop.f32.mrf.mxu1 }
 0x21c   : > { %v1261_v8 = vpack.c.bf16 %v912_v3, %v911_v2  ;;  %v910_v9 = vmax.f32 %v894_v4, 0.0  ;;  %v874_v10 = vmul.f32 %v1972_v36, %v828_v6  ;;  %v899_v13 = vadd.f32 %v1979_v37, %v876_v5 }
 0x21d   : > { %v1381_v11 = vpop.f32.mrf.mxu1 }
 0x21e   : > { %1285 = vst [vmem:[%s1992_s27 + $0x18] sm:$0xff] %v1261_v8   ;;  %v1256_v12 = vpack.c.bf16 %v910_v9, %v909_v7  ;;  %v877_v14 = vmul.f32 %v1381_v11, %v1972_v36  ;;  %v897_v16 = vadd.f32 %v1979_v37, %v874_v10  ;;  %v915_v20 = vmax.f32 %v899_v13, 0.0 }
 0x21f   : > { %v831_v15 = vpop.f32.mrf.mxu1 }
 0x220   : > { %1284 = vst [vmem:[%s1992_s27 + $0x10] sm:$0xff] %v1256_v12   ;;  %v900_v17 = vadd.f32 %v1979_v37, %v877_v14  ;;  %v875_v18 = vmul.f32 %v1972_v36, %v831_v15  ;;  %v913_v26 = vmax.f32 %v897_v16, 0.0 }
 0x221   : > { %v1384_v19 = vpop.f32.mrf.mxu1 }
 0x222   : > { %v916_v21 = vmax.f32 %v900_v17, 0.0  ;;  %v898_v22 = vadd.f32 %v1979_v37, %v875_v18  ;;  %v880_v23 = vmul.f32 %v1384_v19, %v1972_v36 }
 0x223   : > { %v844_v24 = vpop.f32.mrf.mxu1 }
 0x224   : > { %v1271_v27 = vpack.c.bf16 %v916_v21, %v915_v20  ;;  %v914_v28 = vmax.f32 %v898_v22, 0.0  ;;  %v878_v29 = vmul.f32 %v1972_v36, %v844_v24  ;;  %v903_v33 = vadd.f32 %v1979_v37, %v880_v23 }
 0x225   : > { %v1385_v31 = vpop.f32.mrf.mxu1 }
 0x226   : > { %1287 = vst [vmem:[%s1992_s27 + $0x28] sm:$0xff] %v1271_v27   ;;  %v1266_v32 = vpack.c.bf16 %v914_v28, %v913_v26  ;;  %v881_v34 = vmul.f32 %v1385_v31, %v1972_v36  ;;  %v901_v25 = vadd.f32 %v1979_v37, %v878_v29  ;;  %v919_v39 = vmax.f32 %v903_v33, 0.0 }
 0x227   : > { %v847_v35 = vpop.f32.mrf.mxu1 }
 0x228   : > { %1286 = vst [vmem:[%s1992_s27 + $0x20] sm:$0xff] %v1266_v32   ;;  %v904_v30 = vadd.f32 %v1979_v37, %v881_v34  ;;  %v879_v38 = vmul.f32 %v1972_v36, %v847_v35  ;;  %v917_v42 = vmax.f32 %v901_v25, 0.0 }
 0x22a   : > { %v920_v40 = vmax.f32 %v904_v30, 0.0  ;;  %v902_v41 = vadd.f32 %v1979_v37, %v879_v38 }
 0x22c   : > { %v1281_v43 = vpack.c.bf16 %v920_v40, %v919_v39  ;;  %v918_v44 = vmax.f32 %v902_v41, 0.0 }
 0x22e   : > { %1289 = vst [vmem:[%s1992_s27 + $0x38] sm:$0xff] %v1281_v43   ;;  %v1276_v36 = vpack.c.bf16 %v918_v44, %v917_v42 }
 0x230   : > { %1288 = vst [vmem:[%s1992_s27 + $0x30] sm:$0xff] %v1276_v36  }
 0x231   : > { %1606 = shalt.err (!%p1603_p9)
}
 0x232   : > { %s1607_s14 = scalar_lea.hbm %s2028_s19, 1024  ;;  %s1611_s27 = scalar_lea.hbm %s2129_s20, 4096 }
 0x233   : > { %p1608_p11 = scmp.ne.s32.totalorder %s2028_s19, %s1607_s14  ;;  %p1612_p10 = scmp.lt.s32.totalorder %s2028_s19, %s2129_s20 }
 0x234   : > { %p1613_p7 = scmp.lt.s32.totalorder %s1611_s27, %s1607_s14 }
 0x235   : > { %p1609_p12 = pnand %p1608_p11, %p2130_p6 }
 0x236   : > { %p1614_p1 = por %p1613_p7, %p1612_p10 }
 0x237   : > { %p1610_p13 = pneg %p1609_p12 }
 0x239   : > { %p1615_p4 = pnand %p1614_p1, %p1610_p13 }
 0x23b   : > { %1618 = shalt.err (!%p1615_p4)
}
 0x23c   : > { %s1701_s16 = smov 64   ;;  %s1702_s5 = smov 4  }
 0x23d   : > { %1396 = dma.vmem_to_hbm [thread:$0]  (%p2130_p6), %s2030_s11, 1024, %s2028_s19, %s1002_s21, %s1701_s16, %s1701_s16, %s1702_s5  }
 0x23e PF: > { %s2131_s6 = sld [smem:[#allocation12_spill]]  ;;  %p1418_p8 = scmp.ge.s32.totalorder %s1693_s8, 2 }
 0x23f   : > { %s2132_s13 = sld [smem:[#allocation14_spill]] }
 0x244   : > { %s1032_s15 = sand.u32 1, %s2131_s6  }
 0x245   : > { %p2133_p3 = scmp.ne.s32.totalorder %s2132_s13, 0  ;;  %s1033_s12 = scalar_lea.sflag [#allocation4], %s1032_s15 }
 0x247   : > { %p1410_p0 = pnand %p1418_p8, %p2133_p3 }
 0x249   : > { %p1411_p5 = pneg %p1410_p0 }
 0x24b   : > { %1660 = dma.done.wait (%p1411_p5), %s1033_s12, 1024  }
 0x24c   : > { %1662 = vsyncadd (%p1411_p5), %s1033_s12, 4294966272  ;;  %s24_s8 = sadd.s32 1, %s1693_s8   ;;  %s2134_s28 = smov %s1873_s24 }
 0x24d   : > { %p21_p2 = scmp.ge.s32.totalorder %s24_s8, 6   ;;  %s2135_s17 = sld [smem:[#allocation15_spill]] }
 0x24e   : > { %s2136_s24 = smov %s1669_s25  ;;  %s2137_s25 = smov %s1673_s26 }
 0x24f   : > { %s2138_s26 = smov %s2134_s28  ;;  %s2139_s27 = smov %s1685_s29 }
 0x250   : > { %s2140_s28 = smov %s1689_s30  ;;  %s2142_s30 = smov %s2148_s18 }
 0x251   :  { %23 = sbr.rel (!%p21_p2) target bundleno = 14 (0xe), region = 113 }
 0x253   : > { %s2141_s29 = smov %s2135_s17 }
 0x256   :  { %1038 = vsyncpa [#allocation3], 1 }
 0x257   :  { %1040 = vsyncpa [#allocation3 + $0x1], 1 }
 0x258   :  { %1041 = vsyncpa [#allocation6], 1 }
 0x259   :  { %1042 = vsyncpa [#allocation4], 1 }
 0x25a   :  { %1044 = vsyncpa [#allocation4 + $0x1], 1 }

// kernel: tpu_custom_call.1
= control target key start
LH: loop header
LB: loop body
LE: loop exit
PB: predicated region body
PF: predicated region fallthrough
CT: control target
= control target key end

     0   :  { %s2085_s0 = inlined_call_operand.hbm [shape: bf16[2,256,128], index: 0, kind: input, shape index: {}]   ;;  %s2086_s1 = inlined_call_operand.hbm [shape: bf16[128,128], index: 1, kind: input, shape index: {}]   ;;  %s2087_s2 = inlined_call_operand.vmem [shape: f32[2,1,128], index: 2, kind: input, shape index: {}]   ;;  %s2088_s3 = inlined_call_operand.vmem [shape: f32[2,1,128], index: 3, kind: input, shape index: {}]   ;;  %s2089_s4 = inlined_call_operand.hbm [shape: bf16[128,128], index: 4, kind: input, shape index: {}]   ;;  %s2090_s5 = inlined_call_operand.vmem [shape: f32[2,1,128], index: 5, kind: input, shape index: {}]   ;;  %s2091_s6 = inlined_call_operand.vmem [shape: f32[2,1,128], index: 6, kind: input, shape index: {}]   ;;  %s2092_s7 = inlined_call_operand.hbm [shape: bf16[2,256,128], index: 7, kind: output, shape index: {}]  }
   0x1   :  { %2102 = sst [smem:[#allocation17_spill]] %s2086_s1 }
   0x2   :  { %2103 = sst [smem:[#allocation18_spill]] %s2089_s4 }
   0x3   :  { %2104 = sst [smem:[#allocation19_spill]] %s2090_s5 }
   0x4   :  { %2105 = sst [smem:[#allocation20_spill]] %s2091_s6 }
   0x5   :  { %2106 = sst [smem:[#allocation21_spill]] %s2092_s7 }
   0x6   :  { %12 = vsyncpa [#allocation3], 0 }
   0x7   :  { %14 = vsyncpa [#allocation3 + $0x1], 0 }
   0x8   :  { %15 = vsyncpa [#allocation6], 0 }
   0x9   :  { %16 = vsyncpa [#allocation4], 0 }
   0xa   :  { %18 = vsyncpa [#allocation4 + $0x1], 0  ;;  %s1743_s24 = smov 0   ;;  %s1745_s25 = smov 0  }
   0xb   :  { %s1747_s26 = smov 0   ;;  %s1749_s27 = smov 0  }
   0xc   :  { %s1751_s28 = smov 0   ;;  %s1753_s29 = smov 0  }
   0xd   :  { %s1755_s30 = smov 0   ;;  %s1757_s8 = smov 0  }
   0xe LB: > { %2107 = sst [smem:[#allocation12_spill]] %s1665_s24  ;;  %s1162_s9 = sadd.s32 4294967295, %s1693_s8   ;;  %s1693_s8 = sphi %s1757_s8, %s24_s8   ;;  %s1689_s30 = sphi %s1755_s30, %s2142_s30   ;;  %s1685_s29 = sphi %s1753_s29, %s2141_s29   ;;  %s1681_s28 = sphi %s1751_s28, %s2140_s28   ;;  %s1677_s27 = sphi %s1749_s27, %s2139_s27   ;;  %s1673_s26 = sphi %s1747_s26, %s2138_s26   ;;  %s1669_s25 = sphi %s1745_s25, %s2137_s25   ;;  %s1665_s24 = sphi %s1743_s24, %s2136_s24  }
   0xf   : > { %2108 = sst [smem:[#allocation13_spill]] %s1677_s27  ;;  %s1163_s10 = sadd.s32 4294967294, %s1693_s8  }
  0x10   : > { %p58_p0 = scmp.ne.s32.totalorder %s1669_s25, %s1665_s24  ;;  %p1787_p1 = scmp.eq.s32.totalorder %s1162_s9, 0 }
  0x11   : > { %p1791_p2 = scmp.eq.s32.totalorder %s1162_s9, 3  ;;  %p236_p3 = scmp.eq.s32.totalorder %s1163_s10, 3 }
  0x12   : > { %p1797_p4 = por %p1787_p1, %p58_p0  ;;  %p1164_p5 = scmp.ge.s32.totalorder %s1693_s8, 1 }
  0x13   : > { %p1802_p6 = por %p236_p3, %p58_p0  ;;  %p243_p7 = scmp.lt.s32.totalorder %s1693_s8, 5 }
  0x14   : > { %s1695_s16 = smov [#allocation5]   ;;  %s1696_s19 = smov [#allocation7]  }
  0x15   : > { %s2112_s14 = scalar_select %p1802_p6, 1, 0 }
  0x16   : > { %p1807_p8 = pnand %p1164_p5, %p243_p7  ;;  %s255_s17 = sshll.u32 %s1695_s16, 4  ;;  %s256_s17 = int_to_ptr.vmem [resolvable:$true] %s255_s17 }
  0x17   : > { %2113 = sst [smem:[#allocation14_spill]] %s2112_s14  ;;  %s268_s20 = sshll.u32 %s1696_s19, 4  ;;  %s269_s20 = int_to_ptr.vmem [resolvable:$true] %s268_s20 }
  0x18   : > { %p1398_p9 = pneg %p1807_p8  ;;  %s1524_s21 = scalar_lea.vmem %s256_s17, 1024 }
  0x19   : > { %p1525_p12 = scmp.ne.s32.totalorder %s256_s17, %s1524_s21  ;;  %p1532_p3 = scmp.lt.s32.totalorder %s256_s17, %s256_s17 }
  0x1a   : > { %p1815_p10 = pnand %p1398_p9, %p1787_p1  ;;  %p1533_p5 = scmp.lt.s32.totalorder %s1524_s21, %s1524_s21 }
  0x1c   : > { %p1515_p11 = pneg %p1815_p10  ;;  %p1534_p7 = por %p1533_p5, %p1532_p3 }
  0x1e   : > { %p1527_p13 = pnand %p1525_p12, %p1515_p11 }
  0x20   : > { %p1528_p0 = pneg %p1527_p13 }
  0x22   : > { %p1535_p9 = pnand %p1534_p7, %p1528_p0 }
  0x24   : > { %1538 = shalt.err (!%p1535_p9)
}
  0x25   : > { %s2093_s22 = smov 64   ;;  %s2094_s23 = smov 4  }
  0x26   : > { %s2116_s1 = sld [smem:[#allocation17_spill]]  ;;  %s1550_s16 = scalar_lea.vmem %s269_s20, 1024 }
  0x27   : > { %p1551_p12 = scmp.ne.s32.totalorder %s269_s20, %s1550_s16  ;;  %p1558_p0 = scmp.lt.s32.totalorder %s269_s20, %s269_s20 }
  0x28   : > { %p1559_p5 = scmp.lt.s32.totalorder %s1550_s16, %s1550_s16 }
  0x29   : > { %p1553_p13 = pnand %p1551_p12, %p1515_p11 }
  0x2a   : > { %p1560_p7 = por %p1559_p5, %p1558_p0 }
  0x2b   : > { %p1554_p3 = pneg %p1553_p13 }
  0x2c   : > { %1401 = dma.hbm_to_vmem [thread:$0]  (!%p1815_p10), %s2116_s1, 1024, %s256_s17, [#allocation6], %s2093_s22, %s2093_s22, %s2094_s23  }
  0x2d   : > { %p1561_p9 = pnand %p1560_p7, %p1554_p3 }
  0x2f   : > { %1564 = shalt.err (!%p1561_p9)
}
  0x30   : > { %s2117_s4 = sld [smem:[#allocation18_spill]]  ;;  %s33_s17 = sadd.s32 1, %s1685_s29 }
  0x31   : > { %s36_s18 = sadd.s32 1, %s1689_s30  ;;  %p34_p11 = scmp.ge.s32.totalorder %s33_s17, 2 }
  0x32   : > { %s45_s9 = sadd.s32 1, %s1673_s26  ;;  %p52_p12 = scmp.ne.s32.totalorder %s1673_s26, %s1669_s25 }
  0x33   : > { %p53_p13 = scmp.eq.s32.totalorder %s1693_s8, 0  ;;  %s2144_s17 = smov (%p34_p11, %s33_s17), 0 }
  0x34   : > { %2118 = sst [smem:[#allocation15_spill]] %s2144_s17  ;;  %s2146_s18 = smov (!%p34_p11, %s36_s18), %s1689_s30 }
  0x35   : > { %s41_s10 = ssub.s32 %s1685_s29, %s2144_s17  ;;  %p1854_p3 = por %p53_p13, %p52_p12 }
  0x36   : > { %1404 = dma.hbm_to_vmem [thread:$0]  (!%p1815_p10), %s2117_s4, 1024, %s269_s20, [#allocation6], %s2093_s22, %s2093_s22, %s2094_s23  }
  0x37   : > { %p38_p10 = scmp.ge.s32.totalorder %s2146_s18, 2  ;;  %p1860_p0 = por %p1791_p2, %p52_p12 }
  0x38   : > { %p1415_p5 = scmp.lt.s32.totalorder %s1693_s8, 4  ;;  %s282_s19 = sand.u32 1, %s1673_s26  }
  0x39   : > { %s2120_s20 = scalar_select %p1860_p0, 1, 0 }
  0x3a   : > { %s2148_s18 = smov (%p38_p10, %s2146_s18), 0  ;;  %s1168_s21 = sshll.u32 %s282_s19, 6 }
  0x3b   : > { %2121 = sst [smem:[#allocation16_spill]] %s2120_s20  ;;  %s40_s22 = ssub.s32 %s1689_s30, %s2148_s18 }
  0x3c   : > { %s42_s23 = sor.u32 %s41_s10, %s40_s22  ;;  %s1169_s1 = sshll.u32 %s1685_s29, 4 }
  0x3d   : > { %p43_p7 = scmp.eq.s32.totalorder %s42_s23, 0  ;;  %s1170_s4 = sshll.u32 %s1689_s30, 5 }
  0x3e   : > { %s292_s17 = sadd.s32 %s1170_s4, %s1169_s1  ;;  %s286_s14 = scalar_lea.vmem [#allocation2], %s1168_s21 }
  0x3f   : > { %s295_s12 = sshll.u32 %s286_s14, 4  ;;  %s1171_s7 = sshll.u32 %s292_s17, 6  ;;  %s296_s12 = int_to_ptr.vmem [resolvable:$true] %s295_s12 }
  0x40   : > { %s1873_s24 = scalar_select %p43_p7, %s1673_s26, %s45_s9  }
  0x41   : > { %s294_s6 = scalar_lea.hbm %s2085_s0, %s1171_s7  ;;  %p1882_p2 = pnand %p1415_p5, %p1854_p3 }
  0x42   : > { %s283_s22 = scalar_lea.sflag [#allocation3], %s282_s19  ;;  %s1578_s1 = scalar_lea.vmem %s296_s12, 1024 }
  0x43   : > { %p1567_p9 = pneg %p1882_p2  ;;  %p1579_p11 = scmp.ne.s32.totalorder %s296_s12, %s1578_s1 }
  0x44   : > { %s1699_s4 = smov [#allocation2]  }
  0x45   : > { %p1581_p12 = pnand %p1579_p11, %p1567_p9  ;;  %s1583_s14 = sshll.u32 %s1699_s4, 4  ;;  %s1584_s14 = int_to_ptr.vmem [resolvable:$false] %s1583_s14 }
  0x46   : > { %s1585_s23 = scalar_lea.vmem %s1584_s14, 2048  ;;  %p1586_p10 = scmp.lt.s32.totalorder %s296_s12, %s1584_s14 }
  0x47   : > { %p1582_p13 = pneg %p1581_p12  ;;  %p1587_p7 = scmp.lt.s32.totalorder %s1585_s23, %s1578_s1 }
  0x49   : > { %p1588_p6 = por %p1587_p7, %p1586_p10 }
  0x4b   : > { %p1589_p0 = pnand %p1588_p6, %p1582_p13 }
  0x4d   : > { %1592 = shalt.err (!%p1589_p0)
}
  0x4e   : > { %s2123_s7 = smov 4   ;;  %s2124_s27 = smov 64  }
  0x4f   : > { %1408 = dma.hbm_to_vmem [thread:$0]  (!%p1882_p2), %s294_s6, 1024, %s296_s12, %s283_s22, %s2124_s27, %s2124_s27, %s2123_s7  }
  0x50   : > { %331 = sbr.rel (%p1807_p8) target bundleno = 574 (0x23e), region = 48  ;;  %s1896_s17 = sand.u32 (!%p1807_p8), 1, %s1669_s25  }
  0x51   : > { %s1173_s9 = sshll.u32 (!%p1807_p8), %s1896_s17, 6  ;;  %s334_s10 = scalar_lea.sflag (!%p1807_p8), [#allocation3], %s1896_s17 }
  0x52   : > { %s1902_s16 = scalar_lea.vmem (!%p1807_p8), [#allocation2], %s1173_s9 }
  0x55   : > { %1652 = dma.done.wait (%p1797_p4), %s334_s10, 1024  }
  0x56   : > { %1654 = vsyncadd (%p1797_p4), %s334_s10, 4294966272 }
  0x57   : > { %1656 = dma.done.wait (%p1787_p1), [#allocation6], 2048  }
  0x58   : > { %1658 = vsyncadd (%p1787_p1), [#allocation6], 4294965248  ;;  %v1489_v0 = vld [vmem:[#allocation5 + $0x38] sm:$0xff]   ;;  %v1490_v1 = vld [vmem:[#allocation5 + $0x30] sm:$0xff]   ;;  %p389_p1 = scmp.lt.s32.totalorder %s1681_s28, 1  ;;  %s2125_s22 = sld [smem:[#allocation19_spill]] }
  0x59   : > { %1322 = vmatprep.subr.bf16.mxu0 %v1489_v0  ;;  %v1491_v2 = vld [vmem:[#allocation5 + $0x28] sm:$0xff]   ;;  %v1492_v3 = vld [vmem:[#allocation5 + $0x20] sm:$0xff]   ;;  %v1493_v5 = vld [vmem:[#allocation5 + $0x18] sm:$0xff]   ;;  %s2126_s23 = sld [smem:[#allocation20_spill]]  ;;  %s1992_s27 = scalar_lea.vmem [#allocation8], %s1173_s9 }
  0x5a   : > { %1323 = vmatpush3.bf16.msra.mxu0 %v1489_v0  ;;  %v1497_v4 = vld [vmem:[%s1902_s16] sm:$0xff]   ;;  %v1494_v6 = vld [vmem:[#allocation5 + $0x10] sm:$0xff]   ;;  %v1505_v7 = vld [vmem:[#allocation7 + $0x38] sm:$0xff]   ;;  %s1922_s5 = scalar_select %p389_p1, %s1681_s28, 1 }
  0x5b   : > { %1324 = vmatprep.subr.bf16.mxu0 %v1490_v1  ;;  %1338 = vmatprep.mubr.bf16.mxu0 %v1497_v4  ;;  %v1506_v8 = vld [vmem:[#allocation7 + $0x30] sm:$0xff]   ;;  %v1495_v9 = vld [vmem:[#allocation5 + $0x8] sm:$0xff]   ;;  %v1496_v11 = vld [vmem:[#allocation5] sm:$0xff]   ;;  %s2127_s9 = sld [smem:[#allocation13_spill]]  ;;  %s1017_s11 = sshll.u32 %s1992_s27, 4  ;;  %s2030_s11 = int_to_ptr.vmem [resolvable:$true] %s1017_s11 }
  0x5c   : > { %1354 = vmatprep.subr.bf16.mxu1 %v1505_v7  ;;  %v1507_v10 = vld [vmem:[#allocation7 + $0x28] sm:$0xff]   ;;  %v1508_v12 = vld [vmem:[#allocation7 + $0x20] sm:$0xff]   ;;  %v1499_v14 = vld [vmem:[%s1902_s16 + $0x10] sm:$0xff]   ;;  %s391_s13 = scalar_lea.vmem %s2087_s2, %s1922_s5  ;;  %s394_s19 = scalar_lea.vmem %s2088_s3, %s1922_s5 }
  0x5d   : > { %1355 = vmatpush3.bf16.msra.mxu1 %v1505_v7  ;;  %v1498_v13 = vld [vmem:[%s1902_s16 + $0x8] sm:$0xff]   ;;  %v1500_v15 = vld [vmem:[%s1902_s16 + $0x18] sm:$0xff]   ;;  %v1501_v16 = vld [vmem:[%s1902_s16 + $0x20] sm:$0xff]   ;;  %s2129_s20 = sld [smem:[#allocation21_spill]]  ;;  %s1002_s21 = scalar_lea.sflag [#allocation4], %s1896_s17 }
  0x5e   : > { %1325 = vmatpush3.bf16.msra.mxu0 %v1490_v1  ;;  %1356 = vmatprep.subr.bf16.mxu1 %v1506_v8  ;;  %v1502_v17 = vld [vmem:[%s1902_s16 + $0x28] sm:$0xff]   ;;  %v1503_v18 = vld [vmem:[%s1902_s16 + $0x30] sm:$0xff]   ;;  %v1504_v19 = vld [vmem:[%s1902_s16 + $0x38] sm:$0xff]   ;;  %s397_s1 = scalar_lea.vmem %s2125_s22, %s1922_s5  ;;  %s1223_s16 = sshll.u32 %s1681_s28, 5 }
  0x5f   : > { %1326 = vmatprep.subr.bf16.mxu0 %v1491_v2  ;;  %v1509_v20 = vld [vmem:[#allocation7 + $0x18] sm:$0xff]   ;;  %v1510_v21 = vld [vmem:[#allocation7 + $0x10] sm:$0xff]   ;;  %v1511_v22 = vld [vmem:[#allocation7 + $0x8] sm:$0xff]   ;;  %s400_s7 = scalar_lea.vmem %s2126_s23, %s1922_s5  ;;  %s2128_s28 = sld [smem:[#allocation16_spill]] }
  0x60   : > { %v1512_v23 = vld [vmem:[#allocation7] sm:$0xff]   ;;  %s1593_s12 = scalar_lea.vmem %s2030_s11, 1024  ;;  %s1700_s22 = smov [#allocation8]  }
  0x61   : > { %1357 = vmatpush3.bf16.msra.mxu1 %v1506_v8  ;;  %v1928_v25 = vld [vmem:[%s391_s13] ss:$0 sm:$0xff]  ;;  %s1222_s10 = sshll.u32 %s2127_s9, 4  ;;  %p1594_p4 = scmp.ne.s32.totalorder %s2030_s11, %s1593_s12 }
  0x62   : > { %1327 = vmatpush3.bf16.msra.mxu0 %v1491_v2  ;;  %1358 = vmatprep.subr.bf16.mxu1 %v1507_v10  ;;  %v1936_v30 = vld [vmem:[%s394_s19] ss:$0 sm:$0xff]  ;;  %s1014_s5 = sadd.s32 %s1223_s16, %s1222_s10 }
  0x63   : > { %1328 = vmatprep.subr.bf16.mxu0 %v1492_v3  ;;  %s1224_s6 = sshll.u32 %s1014_s5, 6 }
  0x64   : > { %s2028_s19 = scalar_lea.hbm %s2129_s20, %s1224_s6 }
  0x65   : > { %1359 = vmatpush3.bf16.msra.mxu1 %v1507_v10  ;;  %p2130_p6 = scmp.ne.s32.totalorder %s2128_s28, 0 }
  0x66   : > { %1329 = vmatpush3.bf16.msra.mxu0 %v1492_v3  ;;  %1360 = vmatprep.subr.bf16.mxu1 %v1508_v12 }
  0x67   : > { %1330 = vmatprep.subr.bf16.mxu0 %v1493_v5  ;;  %p1595_p8 = pnand %p1594_p4, %p2130_p6 }
  0x69   : > { %1361 = vmatpush3.bf16.msra.mxu1 %v1508_v12  ;;  %p1596_p3 = pneg %p1595_p8 }
  0x6a   : > { %1331 = vmatpush3.bf16.msra.mxu0 %v1493_v5  ;;  %1362 = vmatprep.subr.bf16.mxu1 %v1509_v20 }
  0x6b   : > { %1332 = vmatprep.subr.bf16.mxu0 %v1494_v6 }
  0x6d   : > { %1363 = vmatpush3.bf16.msra.mxu1 %v1509_v20 }
  0x6e   : > { %1333 = vmatpush3.bf16.msra.mxu0 %v1494_v6  ;;  %1364 = vmatprep.subr.bf16.mxu1 %v1510_v21 }
  0x6f   : > { %1334 = vmatprep.subr.bf16.mxu0 %v1495_v9 }
  0x71   : > { %1365 = vmatpush3.bf16.msra.mxu1 %v1510_v21 }
  0x72   : > { %1335 = vmatpush3.bf16.msra.mxu0 %v1495_v9  ;;  %1366 = vmatprep.subr.bf16.mxu1 %v1511_v22 }
  0x73   : > { %1336 = vmatprep.subr.bf16.mxu0 %v1496_v11 }
  0x75   : > { %1367 = vmatpush3.bf16.msra.mxu1 %v1511_v22 }
  0x76   : > { %1337 = vmatpush3.bf16.msra.mxu0 %v1496_v11  ;;  %1368 = vmatprep.subr.bf16.mxu1 %v1512_v23 }
  0x79   : > { %1339 = vmatmul.mubr.bf16.vlgmr.msra.gmra.mxu0 %v1498_v13  ;;  %1369 = vmatpush3.bf16.msra.mxu1 %v1512_v23 }
  0x7a   : > { %1342 = vmatprep.mubr.bf16.mxu0 %v1499_v14 }
  0x81   : > { %1343 = vmatmul.mubr.bf16.gmra.mxu0 %v1500_v15 }
  0x82   : > { %1346 = vmatprep.mubr.bf16.mxu0 %v1501_v16 }
  0x89   : > { %1347 = vmatmul.mubr.bf16.gmra.mxu0 %v1502_v17 }
  0x8a   : > { %1350 = vmatprep.mubr.bf16.mxu0 %v1503_v18 }
  0x91   : > { %1351 = vmatmul.mubr.bf16.gmra.mxu0 %v1504_v19 }
 0x139   : > { %v1340_v24 = vpop.f32.mrf.mxu0 }
 0x13a   : > { %v637_v28 = vmul.f32 %v1340_v24, %v1928_v25 }
 0x13b   : > { %v565_v26 = vpop.f32.mrf.mxu0 }
 0x13c   : > { %v635_v27 = vmul.f32 %v1928_v25, %v565_v26  ;;  %v660_v36 = vadd.f32 %v1936_v30, %v637_v28 }
 0x13d   : > { %v1341_v29 = vpop.f32.mrf.mxu0 }
 0x13e   : > { %v638_v31 = vmul.f32 %v1341_v29, %v1928_v25  ;;  %v658_v35 = vadd.f32 %v1936_v30, %v635_v27  ;;  %v676_v44 = vmax.f32 %v660_v36, 0.0  ;;  %v1972_v36 = vld [vmem:[%s397_s1] ss:$0 sm:$0xff]  ;;  %s1597_s1 = sshll.u32 %s1700_s22, 4  ;;  %s1598_s1 = int_to_ptr.vmem [resolvable:$false] %s1597_s1 }
 0x13f   : > { %v568_v32 = vpop.f32.mrf.mxu0  ;;  %s1599_s4 = scalar_lea.vmem %s1598_s1, 2048  ;;  %p1600_p0 = scmp.lt.s32.totalorder %s2030_s11, %s1598_s1 }
 0x140   : > { %v661_v33 = vadd.f32 %v1936_v30, %v638_v31  ;;  %v636_v34 = vmul.f32 %v1928_v25, %v568_v32  ;;  %v674_v42 = vmax.f32 %v658_v35, 0.0  ;;  %p1601_p5 = scmp.lt.s32.totalorder %s1599_s4, %s1593_s12 }
 0x141   : > { %v1344_v37 = vpop.f32.mrf.mxu0 }
 0x142   : > { %v659_v38 = vadd.f32 %v1936_v30, %v636_v34  ;;  %v677_v39 = vmax.f32 %v661_v33, 0.0  ;;  %v641_v45 = vmul.f32 %v1344_v37, %v1928_v25  ;;  %v1979_v37 = vld [vmem:[%s400_s7] ss:$0 sm:$0xff]  ;;  %p1602_p2 = por %p1601_p5, %p1600_p0 }
 0x143   : > { %v581_v40 = vpop.f32.mrf.mxu0 }
 0x144   : > { %v639_v41 = vmul.f32 %v1928_v25, %v581_v40  ;;  %v675_v43 = vmax.f32 %v659_v38, 0.0  ;;  %v691_v50 = vpack.c.bf16 %v677_v39, %v676_v44  ;;  %v664_v54 = vadd.f32 %v1936_v30, %v641_v45  ;;  %p1603_p9 = pnand %p1602_p2, %p1596_p3 }
 0x145   : > { %v1345_v46 = vpop.f32.mrf.mxu0 }
 0x146   : > { %v642_v47 = vmul.f32 %v1345_v46, %v1928_v25  ;;  %v690_v48 = vpack.c.bf16 %v675_v43, %v674_v42  ;;  %v662_v51 = vadd.f32 %v1936_v30, %v639_v41  ;;  %v680_v62 = vmax.f32 %v664_v54, 0.0 }
 0x147   : > { %v584_v49 = vpop.f32.mrf.mxu0 }
 0x148   : > { %v665_v52 = vadd.f32 %v1936_v30, %v642_v47  ;;  %v640_v53 = vmul.f32 %v1928_v25, %v584_v49  ;;  %1370 = vmatprep.mubr.bf16.mxu1 %v690_v48  ;;  %v678_v59 = vmax.f32 %v662_v51, 0.0 }
 0x149   : > { %v1348_v55 = vpop.f32.mrf.mxu0  ;;  %1371 = vmatmul.mubr.bf16.vlgmr.msra.gmra.mxu1 %v691_v50 }
 0x14a   : > { %v663_v56 = vadd.f32 %v1936_v30, %v640_v53  ;;  %v681_v57 = vmax.f32 %v665_v52, 0.0  ;;  %v645_v63 = vmul.f32 %v1348_v55, %v1928_v25 }
 0x14b   : > { %v597_v58 = vpop.f32.mrf.mxu0 }
 0x14c   : > { %v679_v60 = vmax.f32 %v663_v56, 0.0  ;;  %v643_v61 = vmul.f32 %v1928_v25, %v597_v58  ;;  %v693_v4 = vpack.c.bf16 %v681_v57, %v680_v62  ;;  %v668_v8 = vadd.f32 %v1936_v30, %v645_v63 }
 0x14d   : > { %v1349_v0 = vpop.f32.mrf.mxu0 }
 0x14e   : > { %v646_v1 = vmul.f32 %v1349_v0, %v1928_v25  ;;  %v692_v2 = vpack.c.bf16 %v679_v60, %v678_v59  ;;  %v666_v5 = vadd.f32 %v1936_v30, %v643_v61  ;;  %v684_v16 = vmax.f32 %v668_v8, 0.0 }
 0x14f   : > { %v600_v3 = vpop.f32.mrf.mxu0 }
 0x150   : > { %v669_v6 = vadd.f32 %v1936_v30, %v646_v1  ;;  %v644_v7 = vmul.f32 %v1928_v25, %v600_v3  ;;  %1374 = vmatprep.mubr.bf16.mxu1 %v692_v2  ;;  %v682_v13 = vmax.f32 %v666_v5, 0.0 }
 0x151   : > { %v1352_v9 = vpop.f32.mrf.mxu0  ;;  %1375 = vmatmul.mubr.bf16.gmra.mxu1 %v693_v4 }
 0x152   : > { %v667_v10 = vadd.f32 %v1936_v30, %v644_v7  ;;  %v685_v11 = vmax.f32 %v669_v6, 0.0  ;;  %v649_v17 = vmul.f32 %v1352_v9, %v1928_v25 }
 0x153   : > { %v613_v12 = vpop.f32.mrf.mxu0 }
 0x154   : > { %v683_v14 = vmax.f32 %v667_v10, 0.0  ;;  %v647_v15 = vmul.f32 %v1928_v25, %v613_v12  ;;  %v695_v22 = vpack.c.bf16 %v685_v11, %v684_v16  ;;  %v672_v27 = vadd.f32 %v1936_v30, %v649_v17 }
 0x155   : > { %v1353_v18 = vpop.f32.mrf.mxu0 }
 0x156   : > { %v650_v19 = vmul.f32 %v1353_v18, %v1928_v25  ;;  %v694_v20 = vpack.c.bf16 %v683_v14, %v682_v13  ;;  %v670_v23 = vadd.f32 %v1936_v30, %v647_v15  ;;  %v688_v33 = vmax.f32 %v672_v27, 0.0 }
 0x157   : > { %v616_v21 = vpop.f32.mrf.mxu0 }
 0x158   : > { %v673_v24 = vadd.f32 %v1936_v30, %v650_v19  ;;  %v648_v26 = vmul.f32 %v1928_v25, %v616_v21  ;;  %1378 = vmatprep.mubr.bf16.mxu1 %v694_v20  ;;  %v686_v31 = vmax.f32 %v670_v23, 0.0 }
 0x159   : > { %1379 = vmatmul.mubr.bf16.gmra.mxu1 %v695_v22 }
 0x15a   : > { %v671_v28 = vadd.f32 %v1936_v30, %v648_v26  ;;  %v689_v29 = vmax.f32 %v673_v24, 0.0 }
 0x15c   : > { %v687_v32 = vmax.f32 %v671_v28, 0.0  ;;  %v697_v35 = vpack.c.bf16 %v689_v29, %v688_v33 }
 0x15e   : > { %v696_v34 = vpack.c.bf16 %v687_v32, %v686_v31 }
 0x160   : > { %1382 = vmatprep.mubr.bf16.mxu1 %v696_v34 }
 0x161   : > { %1383 = vmatmul.mubr.bf16.gmra.mxu1 %v697_v35 }
 0x209   : > { %v1372_v25 = vpop.f32.mrf.mxu1 }
 0x20a   : > { %v868_v30 = vmul.f32 %v1372_v25, %v1972_v36 }
 0x20b   : > { %v796_v38 = vpop.f32.mrf.mxu1 }
 0x20c   : > { %v866_v39 = vmul.f32 %v1972_v36, %v796_v38  ;;  %v891_v41 = vadd.f32 %v1979_v37, %v868_v30 }
 0x20d   : > { %v1373_v40 = vpop.f32.mrf.mxu1 }
 0x20e   : > { %v869_v42 = vmul.f32 %v1373_v40, %v1972_v36  ;;  %v889_v44 = vadd.f32 %v1979_v37, %v866_v39  ;;  %v907_v48 = vmax.f32 %v891_v41, 0.0 }
 0x20f   : > { %v799_v43 = vpop.f32.mrf.mxu1 }
 0x210   : > { %v892_v45 = vadd.f32 %v1979_v37, %v869_v42  ;;  %v867_v46 = vmul.f32 %v1972_v36, %v799_v43  ;;  %v905_v53 = vmax.f32 %v889_v44, 0.0 }
 0x211   : > { %v1376_v47 = vpop.f32.mrf.mxu1 }
 0x212   : > { %v908_v49 = vmax.f32 %v892_v45, 0.0  ;;  %v890_v50 = vadd.f32 %v1979_v37, %v867_v46  ;;  %v872_v51 = vmul.f32 %v1376_v47, %v1972_v36 }
 0x213   : > { %v812_v52 = vpop.f32.mrf.mxu1 }
 0x214   : > { %v1251_v54 = vpack.c.bf16 %v908_v49, %v907_v48  ;;  %v906_v55 = vmax.f32 %v890_v50, 0.0  ;;  %v870_v56 = vmul.f32 %v1972_v36, %v812_v52  ;;  %v895_v59 = vadd.f32 %v1979_v37, %v872_v51 }
 0x215   : > { %v1377_v57 = vpop.f32.mrf.mxu1 }
 0x216   : > { %1283 = vst [vmem:[%s1992_s27 + $0x8] sm:$0xff] %v1251_v54   ;;  %v1246_v58 = vpack.c.bf16 %v906_v55, %v905_v53  ;;  %v873_v60 = vmul.f32 %v1377_v57, %v1972_v36  ;;  %v893_v62 = vadd.f32 %v1979_v37, %v870_v56  ;;  %v911_v2 = vmax.f32 %v895_v59, 0.0 }
 0x217   : > { %v815_v61 = vpop.f32.mrf.mxu1 }
 0x218   : > { %1247 = vst [vmem:[%s1992_s27] sm:$0xff] %v1246_v58   ;;  %v896_v63 = vadd.f32 %v1979_v37, %v873_v60  ;;  %v871_v0 = vmul.f32 %v1972_v36, %v815_v61  ;;  %v909_v7 = vmax.f32 %v893_v62, 0.0 }
 0x219   : > { %v1380_v1 = vpop.f32.mrf.mxu1 }
 0x21a   : > { %v912_v3 = vmax.f32 %v896_v63, 0.0  ;;  %v894_v4 = vadd.f32 %v1979_v37, %v871_v0  ;;  %v876_v5 = vmul.f32 %v1380_v1, %v1972_v36 }
 0x21b   : > { %v828_v6 = vpop.f32.mrf.mxu1 }
 0x21c   : > { %v1261_v8 = vpack.c.bf16 %v912_v3, %v911_v2  ;;  %v910_v9 = vmax.f32 %v894_v4, 0.0  ;;  %v874_v10 = vmul.f32 %v1972_v36, %v828_v6  ;;  %v899_v13 = vadd.f32 %v1979_v37, %v876_v5 }
 0x21d   : > { %v1381_v11 = vpop.f32.mrf.mxu1 }
 0x21e   : > { %1285 = vst [vmem:[%s1992_s27 + $0x18] sm:$0xff] %v1261_v8   ;;  %v1256_v12 = vpack.c.bf16 %v910_v9, %v909_v7  ;;  %v877_v14 = vmul.f32 %v1381_v11, %v1972_v36  ;;  %v897_v16 = vadd.f32 %v1979_v37, %v874_v10  ;;  %v915_v20 = vmax.f32 %v899_v13, 0.0 }
 0x21f   : > { %v831_v15 = vpop.f32.mrf.mxu1 }
 0x220   : > { %1284 = vst [vmem:[%s1992_s27 + $0x10] sm:$0xff] %v1256_v12   ;;  %v900_v17 = vadd.f32 %v1979_v37, %v877_v14  ;;  %v875_v18 = vmul.f32 %v1972_v36, %v831_v15  ;;  %v913_v26 = vmax.f32 %v897_v16, 0.0 }
 0x221   : > { %v1384_v19 = vpop.f32.mrf.mxu1 }
 0x222   : > { %v916_v21 = vmax.f32 %v900_v17, 0.0  ;;  %v898_v22 = vadd.f32 %v1979_v37, %v875_v18  ;;  %v880_v23 = vmul.f32 %v1384_v19, %v1972_v36 }
 0x223   : > { %v844_v24 = vpop.f32.mrf.mxu1 }
 0x224   : > { %v1271_v27 = vpack.c.bf16 %v916_v21, %v915_v20  ;;  %v914_v28 = vmax.f32 %v898_v22, 0.0  ;;  %v878_v29 = vmul.f32 %v1972_v36, %v844_v24  ;;  %v903_v33 = vadd.f32 %v1979_v37, %v880_v23 }
 0x225   : > { %v1385_v31 = vpop.f32.mrf.mxu1 }
 0x226   : > { %1287 = vst [vmem:[%s1992_s27 + $0x28] sm:$0xff] %v1271_v27   ;;  %v1266_v32 = vpack.c.bf16 %v914_v28, %v913_v26  ;;  %v881_v34 = vmul.f32 %v1385_v31, %v1972_v36  ;;  %v901_v25 = vadd.f32 %v1979_v37, %v878_v29  ;;  %v919_v39 = vmax.f32 %v903_v33, 0.0 }
 0x227   : > { %v847_v35 = vpop.f32.mrf.mxu1 }
 0x228   : > { %1286 = vst [vmem:[%s1992_s27 + $0x20] sm:$0xff] %v1266_v32   ;;  %v904_v30 = vadd.f32 %v1979_v37, %v881_v34  ;;  %v879_v38 = vmul.f32 %v1972_v36, %v847_v35  ;;  %v917_v42 = vmax.f32 %v901_v25, 0.0 }
 0x22a   : > { %v920_v40 = vmax.f32 %v904_v30, 0.0  ;;  %v902_v41 = vadd.f32 %v1979_v37, %v879_v38 }
 0x22c   : > { %v1281_v43 = vpack.c.bf16 %v920_v40, %v919_v39  ;;  %v918_v44 = vmax.f32 %v902_v41, 0.0 }
 0x22e   : > { %1289 = vst [vmem:[%s1992_s27 + $0x38] sm:$0xff] %v1281_v43   ;;  %v1276_v36 = vpack.c.bf16 %v918_v44, %v917_v42 }
 0x230   : > { %1288 = vst [vmem:[%s1992_s27 + $0x30] sm:$0xff] %v1276_v36  }
 0x231   : > { %1606 = shalt.err (!%p1603_p9)
}
 0x232   : > { %s1607_s14 = scalar_lea.hbm %s2028_s19, 1024  ;;  %s1611_s27 = scalar_lea.hbm %s2129_s20, 4096 }
 0x233   : > { %p1608_p11 = scmp.ne.s32.totalorder %s2028_s19, %s1607_s14  ;;  %p1612_p10 = scmp.lt.s32.totalorder %s2028_s19, %s2129_s20 }
 0x234   : > { %p1613_p7 = scmp.lt.s32.totalorder %s1611_s27, %s1607_s14 }
 0x235   : > { %p1609_p12 = pnand %p1608_p11, %p2130_p6 }
 0x236   : > { %p1614_p1 = por %p1613_p7, %p1612_p10 }
 0x237   : > { %p1610_p13 = pneg %p1609_p12 }
 0x239   : > { %p1615_p4 = pnand %p1614_p1, %p1610_p13 }
 0x23b   : > { %1618 = shalt.err (!%p1615_p4)
}
 0x23c   : > { %s1701_s16 = smov 64   ;;  %s1702_s5 = smov 4  }
 0x23d   : > { %1396 = dma.vmem_to_hbm [thread:$0]  (%p2130_p6), %s2030_s11, 1024, %s2028_s19, %s1002_s21, %s1701_s16, %s1701_s16, %s1702_s5  }
 0x23e PF: > { %s2131_s6 = sld [smem:[#allocation12_spill]]  ;;  %p1418_p8 = scmp.ge.s32.totalorder %s1693_s8, 2 }
 0x23f   : > { %s2132_s13 = sld [smem:[#allocation14_spill]] }
 0x244   : > { %s1032_s15 = sand.u32 1, %s2131_s6  }
 0x245   : > { %p2133_p3 = scmp.ne.s32.totalorder %s2132_s13, 0  ;;  %s1033_s12 = scalar_lea.sflag [#allocation4], %s1032_s15 }
 0x247   : > { %p1410_p0 = pnand %p1418_p8, %p2133_p3 }
 0x249   : > { %p1411_p5 = pneg %p1410_p0 }
 0x24b   : > { %1660 = dma.done.wait (%p1411_p5), %s1033_s12, 1024  }
 0x24c   : > { %1662 = vsyncadd (%p1411_p5), %s1033_s12, 4294966272  ;;  %s24_s8 = sadd.s32 1, %s1693_s8   ;;  %s2134_s28 = smov %s1873_s24 }
 0x24d   : > { %p21_p2 = scmp.ge.s32.totalorder %s24_s8, 6   ;;  %s2135_s17 = sld [smem:[#allocation15_spill]] }
 0x24e   : > { %s2136_s24 = smov %s1669_s25  ;;  %s2137_s25 = smov %s1673_s26 }
 0x24f   : > { %s2138_s26 = smov %s2134_s28  ;;  %s2139_s27 = smov %s1685_s29 }
 0x250   : > { %s2140_s28 = smov %s1689_s30  ;;  %s2142_s30 = smov %s2148_s18 }
 0x251   :  { %23 = sbr.rel (!%p21_p2) target bundleno = 14 (0xe), region = 113 }
 0x253   : > { %s2141_s29 = smov %s2135_s17 }
 0x256   :  { %1038 = vsyncpa [#allocation3], 1 }
 0x257   :  { %1040 = vsyncpa [#allocation3 + $0x1], 1 }
 0x258   :  { %1041 = vsyncpa [#allocation6], 1 }
 0x259   :  { %1042 = vsyncpa [#allocation4], 1 }
 0x25a   :  { %1044 = vsyncpa [#allocation4 + $0x1], 1 }

</bundles_post_ra>
